<compile_context>
chip_gen: v6e
topology: v6e:2x2x1
jax: 0.10.0
libtpu: 0.0.40
codegen_flags: <defaults>
</compile_context>

<pallas_src>
import functools
import math

import jax
import jax.numpy as jnp
from jax.experimental import pallas as pl
from jax.experimental.pallas import tpu as pltpu


VMEM_LIMIT = 32 * 1024 * 1024  # safe on v5e/v6e (128 MiB) and v7x (64 MiB)


def _pick_tile(dim, candidates=(512, 256, 128)):
    """Largest aligned tile that evenly divides `dim`; else the full dim."""
    for t in candidates:
        if dim % t == 0:
            return t
    return dim


# ----------------------------- Pallas kernels -----------------------------

def _layernorm_rows(x, g, b, eps):
    """torch-style LayerNorm on [rows, D] in f32: a*(x-mean)/(std+eps)+b."""
    mean = jnp.mean(x, axis=-1, keepdims=True)
    diff = x - mean
    var = jnp.sum(diff * diff, axis=-1, keepdims=True) / (x.shape[-1] - 1)
    std = jnp.sqrt(var)
    return g * diff / (std + eps) + b


def _layernorm_kernel(x_ref, g_ref, b_ref, o_ref, *, eps):
    x = x_ref[...].astype(jnp.float32)
    y = _layernorm_rows(x, g_ref[...].astype(jnp.float32),
                        b_ref[...].astype(jnp.float32), eps)
    o_ref[...] = y.astype(o_ref.dtype)


def layernorm(x2d, gamma, beta, eps=1e-6):
    M, D = x2d.shape
    tm = _pick_tile(M)
    return pl.pallas_call(
        functools.partial(_layernorm_kernel, eps=eps),
        out_shape=jax.ShapeDtypeStruct((M, D), x2d.dtype),
        grid=(M // tm,),
        in_specs=[pl.BlockSpec((tm, D), lambda i: (i, 0)),
                  pl.BlockSpec((1, D), lambda i: (0, 0)),
                  pl.BlockSpec((1, D), lambda i: (0, 0))],
        out_specs=pl.BlockSpec((tm, D), lambda i: (i, 0)),
        compiler_params=pltpu.CompilerParams(
            dimension_semantics=("parallel",),
            vmem_limit_bytes=VMEM_LIMIT),
    )(x2d, gamma.reshape(1, D), beta.reshape(1, D))


def _ln_linear_kernel(x_ref, g_ref, b_ref, w_ref, bias_ref, o_ref, *, eps):
    x = x_ref[...].astype(jnp.float32)                       # [tm, D]
    xn = _layernorm_rows(x, g_ref[...].astype(jnp.float32),
                         b_ref[...].astype(jnp.float32), eps)
    y = jnp.dot(xn, w_ref[...].astype(jnp.float32),
                preferred_element_type=jnp.float32)
    y = y + bias_ref[...].astype(jnp.float32)
    o_ref[...] = y.astype(o_ref.dtype)


def ln_linear(x2d, gamma, beta, w, bias, eps=1e-6):
    """Fused LayerNorm(x) @ w + bias.  Full-D rows (LN needs the whole row)."""
    M, D = x2d.shape
    N = w.shape[1]
    tm, tn = _pick_tile(M), _pick_tile(N)
    cost = pl.CostEstimate(flops=2 * M * D * N, transcendentals=0,
                           bytes_accessed=4 * (M * D + D * N + M * N))
    return pl.pallas_call(
        functools.partial(_ln_linear_kernel, eps=eps),
        out_shape=jax.ShapeDtypeStruct((M, N), x2d.dtype),
        grid=(M // tm, N // tn),
        in_specs=[pl.BlockSpec((tm, D), lambda i, j: (i, 0)),
                  pl.BlockSpec((1, D), lambda i, j: (0, 0)),
                  pl.BlockSpec((1, D), lambda i, j: (0, 0)),
                  pl.BlockSpec((D, tn), lambda i, j: (0, j)),
                  pl.BlockSpec((1, tn), lambda i, j: (0, j))],
        out_specs=pl.BlockSpec((tm, tn), lambda i, j: (i, j)),
        compiler_params=pltpu.CompilerParams(
            dimension_semantics=("parallel", "parallel"),
            vmem_limit_bytes=VMEM_LIMIT),
        cost_estimate=cost,
    )(x2d, gamma.reshape(1, D), beta.reshape(1, D), w, bias.reshape(1, N))


def _linear_kernel(x_ref, w_ref, bias_ref, *rest, relu, has_residual):
    if has_residual:
        res_ref, o_ref, acc_ref = rest
    else:
        res_ref = None
        o_ref, acc_ref = rest
    k = pl.program_id(2)

    @pl.when(k == 0)
    def _():
        acc_ref[...] = jnp.zeros_like(acc_ref)

    acc_ref[...] += jnp.dot(x_ref[...].astype(jnp.float32),
                            w_ref[...].astype(jnp.float32),
                            preferred_element_type=jnp.float32)

    @pl.when(k == pl.num_programs(2) - 1)
    def _():
        y = acc_ref[...] + bias_ref[...].astype(jnp.float32)
        if relu:
            y = jnp.maximum(y, 0.0)
        if has_residual:
            y = y + res_ref[...].astype(jnp.float32)
        o_ref[...] = y.astype(o_ref.dtype)


def linear(x2d, w, bias, relu=False, residual=None):
    """Tiled (M, N, K) matmul with f32 accumulator; optional fused residual."""
    M, K = x2d.shape
    N = w.shape[1]
    tm, tn, tk = _pick_tile(M), _pick_tile(N), _pick_tile(K)
    has_residual = residual is not None
    cost = pl.CostEstimate(flops=2 * M * K * N, transcendentals=0,
                           bytes_accessed=4 * (M * K + K * N + M * N))
    in_specs = [pl.BlockSpec((tm, tk), lambda i, j, k: (i, k)),
                pl.BlockSpec((tk, tn), lambda i, j, k: (k, j)),
                pl.BlockSpec((1, tn), lambda i, j, k: (0, j))]
    args = [x2d, w, bias.reshape(1, N)]
    if has_residual:
        in_specs.append(pl.BlockSpec((tm, tn), lambda i, j, k: (i, j)))
        args.append(residual)
    return pl.pallas_call(
        functools.partial(_linear_kernel, relu=relu, has_residual=has_residual),
        out_shape=jax.ShapeDtypeStruct((M, N), x2d.dtype),
        grid=(M // tm, N // tn, K // tk),
        in_specs=in_specs,
        out_specs=pl.BlockSpec((tm, tn), lambda i, j, k: (i, j)),
        scratch_shapes=[pltpu.VMEM((tm, tn), jnp.float32)],
        compiler_params=pltpu.CompilerParams(
            dimension_semantics=("parallel", "parallel", "arbitrary"),
            vmem_limit_bytes=VMEM_LIMIT),
        cost_estimate=cost,
    )(*args)


def _ln_ffn_kernel(x_ref, g_ref, b_ref, w1_ref, b1_ref, w2_ref, b2_ref, o_ref,
                   xn_ref, acc_ref, *, eps):
    f = pl.program_id(1)

    @pl.when(f == 0)
    def _():
        x = x_ref[...].astype(jnp.float32)
        xn_ref[...] = _layernorm_rows(x, g_ref[...].astype(jnp.float32),
                                      b_ref[...].astype(jnp.float32), eps)
        acc_ref[...] = jnp.zeros_like(acc_ref)

    h = jnp.dot(xn_ref[...], w1_ref[...].astype(jnp.float32),
                preferred_element_type=jnp.float32)
    h = jnp.maximum(h + b1_ref[...].astype(jnp.float32), 0.0)
    acc_ref[...] += jnp.dot(h, w2_ref[...].astype(jnp.float32),
                            preferred_element_type=jnp.float32)

    @pl.when(f == pl.num_programs(1) - 1)
    def _():
        # residual add fused: x tile is already resident in VMEM.
        y = (x_ref[...].astype(jnp.float32)
             + acc_ref[...] + b2_ref[...].astype(jnp.float32))
        o_ref[...] = y.astype(o_ref.dtype)


def ln_ffn(x2d, gamma, beta, w1, b1, w2, b2, eps=1e-6):
    """Fused x + (LN(x) @ w1 + b1).relu() @ w2 + b2, d_ff as reduction axis."""
    M, D = x2d.shape
    F = w1.shape[1]
    tm, tf = _pick_tile(M), _pick_tile(F)
    cost = pl.CostEstimate(flops=4 * M * D * F, transcendentals=0,
                           bytes_accessed=4 * (2 * M * D + 2 * D * F))
    return pl.pallas_call(
        functools.partial(_ln_ffn_kernel, eps=eps),
        out_shape=jax.ShapeDtypeStruct((M, D), x2d.dtype),
        grid=(M // tm, F // tf),
        in_specs=[pl.BlockSpec((tm, D), lambda i, f: (i, 0)),
                  pl.BlockSpec((1, D), lambda i, f: (0, 0)),
                  pl.BlockSpec((1, D), lambda i, f: (0, 0)),
                  pl.BlockSpec((D, tf), lambda i, f: (0, f)),
                  pl.BlockSpec((1, tf), lambda i, f: (0, f)),
                  pl.BlockSpec((tf, D), lambda i, f: (f, 0)),
                  pl.BlockSpec((1, D), lambda i, f: (0, 0))],
        out_specs=pl.BlockSpec((tm, D), lambda i, f: (i, 0)),
        scratch_shapes=[pltpu.VMEM((tm, D), jnp.float32),
                        pltpu.VMEM((tm, D), jnp.float32)],
        compiler_params=pltpu.CompilerParams(
            dimension_semantics=("parallel", "arbitrary"),
            vmem_limit_bytes=VMEM_LIMIT),
        cost_estimate=cost,
    )(x2d, gamma.reshape(1, D), beta.reshape(1, D),
      w1, b1.reshape(1, F), w2, b2.reshape(1, D))


def _attention_kernel(q_ref, k_ref, v_ref, m_ref, o_ref, *, scale):
    q = q_ref[0].astype(jnp.float32) * scale   # [h, T, dk]  (pre-scale q)
    k = k_ref[0].astype(jnp.float32)           # [h, S, dk]
    v = v_ref[0].astype(jnp.float32)           # [h, S, dk]
    mask = m_ref[0]                            # [Tm, S] (Tm in {1, T})

    # Batched Q.K^T contracting the last dims (no materialized transpose of K).
    scores = jax.lax.dot_general(
        q, k, (((2,), (2,)), ((0,), (0,))),
        preferred_element_type=jnp.float32)                   # [h, T, S]
    scores = jnp.where(mask[None, :, :] == 0, jnp.float32(-1e9), scores)

    scores = scores - jnp.max(scores, axis=-1, keepdims=True)
    p = jnp.exp(scores)
    p = p * pl.reciprocal(jnp.sum(p, axis=-1, keepdims=True), approx=True)

    out = jax.lax.dot_general(
        p, v, (((2,), (1,)), ((0,), (0,))),
        preferred_element_type=jnp.float32)                   # [h, T, dk]
    o_ref[0] = out.astype(o_ref.dtype)


def sdpa(q, k, v, mask):
    """q: [B, h, T, dk]; k/v: [B, h, S, dk]; mask: [Bm, Tm, S] (0 => masked).

    One grid step processes all heads of one batch; the (small) mask is
    indexed in HBM via the BlockSpec instead of broadcast to [B*h, T, S].
    """
    B, H, T, dk = q.shape
    S = k.shape[2]
    Bm, Tm, _ = mask.shape
    if Bm == 1:
        m_map = lambda b: (0, 0, 0)
    else:
        m_map = lambda b: (b, 0, 0)
    cost = pl.CostEstimate(
        flops=4 * B * H * T * S * dk,
        transcendentals=B * H * T * S,
        bytes_accessed=4 * (2 * B * H * T * dk + 2 * B * H * S * dk
                            + Bm * Tm * S))
    return pl.pallas_call(
        functools.partial(_attention_kernel, scale=1.0 / math.sqrt(dk)),
        out_shape=jax.ShapeDtypeStruct((B, H, T, dk), q.dtype),
        grid=(B,),
        in_specs=[pl.BlockSpec((1, H, T, dk), lambda b: (b, 0, 0, 0)),
                  pl.BlockSpec((1, H, S, dk), lambda b: (b, 0, 0, 0)),
                  pl.BlockSpec((1, H, S, dk), lambda b: (b, 0, 0, 0)),
                  pl.BlockSpec((1, Tm, S), m_map)],
        out_specs=pl.BlockSpec((1, H, T, dk), lambda b: (b, 0, 0, 0)),
        compiler_params=pltpu.CompilerParams(
            dimension_semantics=("parallel",),
            vmem_limit_bytes=VMEM_LIMIT),
        cost_estimate=cost,
    )(q, k, v, mask.astype(jnp.int32))


# ------------------------- model glue (plain JAX) -------------------------

def self_attention_block(p, ln_g, ln_b, x, mask, h):
    """Pre-norm self-attention: x + out_proj(SDPA(qkv(LN(x))))."""
    B, T, D = x.shape
    dk = D // h
    x2d = x.reshape(-1, D)
    qkv = ln_linear(x2d, ln_g, ln_b, p["wqkv"], p["bqkv"])               # [B*T, 3D]
    qkv = qkv.reshape(B, T, 3, h, dk).transpose(2, 0, 3, 1, 4)           # [3, B, h, T, dk]
    q, k, v = qkv[0], qkv[1], qkv[2]
    out = sdpa(q, k, v, mask)                                            # [B, h, T, dk]
    out = out.transpose(0, 2, 1, 3).reshape(B * T, D)
    return linear(out, p["wo"], p["bo"], residual=x2d).reshape(B, T, D)


def src_attention_block(p, ln_g, ln_b, x, memory, mask, h):
    """Pre-norm cross-attention: q from LN(x); k,v from memory (fused K|V)."""
    B, T, D = x.shape
    S = memory.shape[1]
    dk = D // h
    x2d = x.reshape(-1, D)
    q = ln_linear(x2d, ln_g, ln_b, p["wq"], p["bq"])
    q = q.reshape(B, T, h, dk).transpose(0, 2, 1, 3)                     # [B, h, T, dk]
    kv = linear(memory.reshape(-1, D), p["wkv"], p["bkv"])               # [B*S, 2D]
    kv = kv.reshape(B, S, 2, h, dk).transpose(2, 0, 3, 1, 4)             # [2, B, h, S, dk]
    k, v = kv[0], kv[1]
    out = sdpa(q, k, v, mask)
    out = out.transpose(0, 2, 1, 3).reshape(B * T, D)
    return linear(out, p["wo"], p["bo"], residual=x2d).reshape(B, T, D)


def decoder_layer(p, x, memory, src_mask, tgt_mask, h):
    B, T, D = x.shape
    x = self_attention_block(p["self_attn"], p["ln1_g"], p["ln1_b"],
                             x, tgt_mask, h)
    x = src_attention_block(p["src_attn"], p["ln2_g"], p["ln2_b"],
                            x, memory, src_mask, h)
    x = ln_ffn(x.reshape(-1, D), p["ln3_g"], p["ln3_b"],
               p["ff_w1"], p["ff_b1"], p["ff_w2"], p["ff_b2"]).reshape(B, T, D)
    return x


def decoder_forward(params, x, memory, src_mask, tgt_mask, h):
    for lp in params["layers"]:
        x = decoder_layer(lp, x, memory, src_mask, tgt_mask, h)
    B, T, D = x.shape
    return layernorm(x.reshape(-1, D), params["norm_g"],
                     params["norm_b"]).reshape(B, T, D)


# --------------------------- deterministic init ---------------------------

def init_params(key, N, D, d_ff):
    def dense(k, din, dout):
        w = 0.02 * jax.random.normal(k, (din, dout), jnp.float32)
        return w, jnp.zeros((dout,), jnp.float32)

    def self_attn_params(k):
        ks = jax.random.split(k, 2)
        wqkv, bqkv = dense(ks[0], D, 3 * D)   # fused [wq | wk | wv]
        wo, bo = dense(ks[1], D, D)
        return {"wqkv": wqkv, "bqkv": bqkv, "wo": wo, "bo": bo}

    def src_attn_params(k):
        ks = jax.random.split(k, 3)
        wq, bq = dense(ks[0], D, D)
        wkv, bkv = dense(ks[1], D, 2 * D)     # fused [wk | wv] on memory
        wo, bo = dense(ks[2], D, D)
        return {"wq": wq, "bq": bq, "wkv": wkv, "bkv": bkv, "wo": wo, "bo": bo}

    layers = []
    keys = jax.random.split(key, N)
    for lk in keys:
        ks = jax.random.split(lk, 4)
        w1, b1 = dense(ks[2], D, d_ff)
        w2, b2 = dense(ks[3], d_ff, D)
        layers.append({
            "self_attn": self_attn_params(ks[0]),
            "src_attn": src_attn_params(ks[1]),
            "ff_w1": w1, "ff_b1": b1, "ff_w2": w2, "ff_b2": b2,
            "ln1_g": jnp.ones((D,), jnp.float32), "ln1_b": jnp.zeros((D,), jnp.float32),
            "ln2_g": jnp.ones((D,), jnp.float32), "ln2_b": jnp.zeros((D,), jnp.float32),
            "ln3_g": jnp.ones((D,), jnp.float32), "ln3_b": jnp.zeros((D,), jnp.float32),
        })
    return {
        "layers": layers,
        "norm_g": jnp.ones((D,), jnp.float32),
        "norm_b": jnp.zeros((D,), jnp.float32),
    }


# --------------------------------- main ---------------------------------

if __name__ == "__main__":
    B, T, S, D, H, D_FF, N_LAYERS = 2, 8, 8, 32, 4, 64, 2

    key = jax.random.PRNGKey(0)
    k_x, k_mem, k_param = jax.random.split(key, 3)

    x = jax.random.normal(k_x, (B, T, D), jnp.float32)
    memory = jax.random.normal(k_mem, (B, S, D), jnp.float32)
    # causal target mask [1, T, T]; full source mask [1, 1, S]
    tgt_mask = jnp.tril(jnp.ones((T, T), jnp.int32))[None, :, :]
    src_mask = jnp.ones((1, 1, S), jnp.int32)

    params = init_params(k_param, N_LAYERS, D, D_FF)

    fwd = jax.jit(decoder_forward, static_argnums=(5,))
    out = fwd(params, x, memory, src_mask, tgt_mask, H)
    out = jax.block_until_ready(out)
    assert out.shape == (B, T, D) and out.dtype == jnp.float32
    assert bool(jnp.all(jnp.isfinite(out)))
    print("KERNEL_OK")
</pallas_src>

<mosaic_0001>
module attributes {stable_mosaic.version = 11 : i64} {
  func.func @_ln_linear_kernel(%arg0: i32, %arg1: i32, %arg2: memref<16x32xf32, #tpu.memory_space<vmem>>, %arg3: memref<1x32xf32, #tpu.memory_space<vmem>>, %arg4: memref<1x32xf32, #tpu.memory_space<vmem>>, %arg5: memref<32x96xf32, #tpu.memory_space<vmem>>, %arg6: memref<1x96xf32, #tpu.memory_space<vmem>>, %arg7: memref<16x96xf32, #tpu.memory_space<vmem>>) attributes {dimension_semantics = [#tpu.dimension_semantics<parallel>, #tpu.dimension_semantics<parallel>], iteration_bounds = array<i64: 1, 1>, scalar_prefetch = 0 : i64, scratch_operands = 0 : i64, tpu.core_type = #tpu.core_type<tc>, window_params = [{transform_indices = @transform_0, window_bounds = array<i64: 16, 32>}, {pipeline_mode = #tpu.pipeline_mode<synchronous>, transform_indices = @transform_1, window_bounds = array<i64: 1, 32>}, {pipeline_mode = #tpu.pipeline_mode<synchronous>, transform_indices = @transform_2, window_bounds = array<i64: 1, 32>}, {transform_indices = @transform_3, window_bounds = array<i64: 32, 96>}, {transform_indices = @transform_4, window_bounds = array<i64: 1, 96>}, {transform_indices = @transform_5, window_bounds = array<i64: 16, 96>}]} {
    %c0 = arith.constant 0 : index
    %c0_0 = arith.constant 0 : index
    %0 = vector.load %arg2[%c0, %c0_0] : memref<16x32xf32, #tpu.memory_space<vmem>>, vector<16x32xf32>
    %c0_1 = arith.constant 0 : index
    %c0_2 = arith.constant 0 : index
    %1 = vector.load %arg3[%c0_1, %c0_2] : memref<1x32xf32, #tpu.memory_space<vmem>>, vector<1x32xf32>
    %c0_3 = arith.constant 0 : index
    %c0_4 = arith.constant 0 : index
    %2 = vector.load %arg4[%c0_3, %c0_4] : memref<1x32xf32, #tpu.memory_space<vmem>>, vector<1x32xf32>
    %cst = arith.constant dense<0.000000e+00> : vector<16xf32>
    %3 = vector.multi_reduction <add>, %0, %cst [1] : vector<16x32xf32> to vector<16xf32>
    %4 = vector.shape_cast %3 : vector<16xf32> to vector<16x1xf32>
    %cst_5 = arith.constant 3.200000e+01 : f32
    %5 = vector.broadcast %cst_5 : f32 to vector<16x1xf32>
    %6 = arith.divf %4, %5 : vector<16x1xf32>
    %7 = vector.broadcast %6 : vector<16x1xf32> to vector<16x32xf32>
    %8 = arith.subf %0, %7 : vector<16x32xf32>
    %9 = arith.mulf %8, %8 : vector<16x32xf32>
    %cst_6 = arith.constant dense<0.000000e+00> : vector<16xf32>
    %10 = vector.multi_reduction <add>, %9, %cst_6 [1] : vector<16x32xf32> to vector<16xf32>
    %11 = vector.shape_cast %10 : vector<16xf32> to vector<16x1xf32>
    %cst_7 = arith.constant 3.100000e+01 : f32
    %12 = vector.broadcast %cst_7 : f32 to vector<16x1xf32>
    %13 = arith.divf %11, %12 : vector<16x1xf32>
    %14 = math.sqrt %13 : vector<16x1xf32>
    %15 = vector.broadcast %1 : vector<1x32xf32> to vector<16x32xf32>
    %16 = arith.mulf %15, %8 : vector<16x32xf32>
    %cst_8 = arith.constant 9.99999997E-7 : f32
    %17 = vector.broadcast %cst_8 : f32 to vector<16x1xf32>
    %18 = arith.addf %14, %17 : vector<16x1xf32>
    %19 = vector.broadcast %18 : vector<16x1xf32> to vector<16x32xf32>
    %20 = arith.divf %16, %19 : vector<16x32xf32>
    %21 = vector.broadcast %2 : vector<1x32xf32> to vector<16x32xf32>
    %22 = arith.addf %20, %21 : vector<16x32xf32>
    %c0_9 = arith.constant 0 : index
    %c0_10 = arith.constant 0 : index
    %23 = vector.load %arg5[%c0_9, %c0_10] : memref<32x96xf32, #tpu.memory_space<vmem>>, vector<32x96xf32>
    %cst_11 = arith.constant dense<0.000000e+00> : vector<16x96xf32>
    %24 = tpu.matmul %22, %23, %cst_11 {dimension_numbers = #tpu.dot_dimension_numbers<[1], [0], [0], [1], [0, 0, 1, 1], [], []>} : vector<16x32xf32>, vector<32x96xf32>, vector<16x96xf32> -> vector<16x96xf32>
    %c0_12 = arith.constant 0 : index
    %c0_13 = arith.constant 0 : index
    %25 = vector.load %arg6[%c0_12, %c0_13] : memref<1x96xf32, #tpu.memory_space<vmem>>, vector<1x96xf32>
    %26 = vector.broadcast %25 : vector<1x96xf32> to vector<16x96xf32>
    %27 = arith.addf %24, %26 : vector<16x96xf32>
    %c0_14 = arith.constant 0 : index
    %c0_15 = arith.constant 0 : index
    %28 = vector.load %arg7[%c0_14, %c0_15] : memref<16x96xf32, #tpu.memory_space<vmem>>, vector<16x96xf32>
    tpu.vector_store %arg7[%c0_14, %c0_15], %27 {strides = array<i32>} : memref<16x96xf32, #tpu.memory_space<vmem>>, vector<16x96xf32>,
    return
  }
  func.func @transform_0(%arg0: i32, %arg1: i32) -> (i32, i32) {
    %c0_i32 = arith.constant 0 : i32
    %c0_i32_0 = arith.constant 0 : i32
    return %arg0, %c0_i32 : i32, i32
  }
  func.func @transform_1(%arg0: i32, %arg1: i32) -> (i32, i32) {
    %c0_i32 = arith.constant 0 : i32
    %c0_i32_0 = arith.constant 0 : i32
    %c0_i32_1 = arith.constant 0 : i32
    return %c0_i32, %c0_i32_0 : i32, i32
  }
  func.func @transform_2(%arg0: i32, %arg1: i32) -> (i32, i32) {
    %c0_i32 = arith.constant 0 : i32
    %c0_i32_0 = arith.constant 0 : i32
    %c0_i32_1 = arith.constant 0 : i32
    return %c0_i32, %c0_i32_0 : i32, i32
  }
  func.func @transform_3(%arg0: i32, %arg1: i32) -> (i32, i32) {
    %c0_i32 = arith.constant 0 : i32
    %c0_i32_0 = arith.constant 0 : i32
    return %c0_i32, %arg1 : i32, i32
  }
  func.func @transform_4(%arg0: i32, %arg1: i32) -> (i32, i32) {
    %c0_i32 = arith.constant 0 : i32
    %c0_i32_0 = arith.constant 0 : i32
    return %c0_i32, %arg1 : i32, i32
  }
  func.func @transform_5(%arg0: i32, %arg1: i32) -> (i32, i32) {
    %c0_i32 = arith.constant 0 : i32
    return %arg0, %arg1 : i32, i32
  }
}

module attributes {stable_mosaic.version = 11 : i64} {
  func.func @_attention_kernel(%arg0: i32, %arg1: memref<1x4x8x8xf32, #tpu.memory_space<vmem>>, %arg2: memref<1x4x8x8xf32, #tpu.memory_space<vmem>>, %arg3: memref<1x4x8x8xf32, #tpu.memory_space<vmem>>, %arg4: memref<1x8x8xi32, #tpu.memory_space<vmem>>, %arg5: memref<1x4x8x8xf32, #tpu.memory_space<vmem>>) attributes {dimension_semantics = [#tpu.dimension_semantics<parallel>], iteration_bounds = array<i64: 2>, scalar_prefetch = 0 : i64, scratch_operands = 0 : i64, tpu.core_type = #tpu.core_type<tc>, window_params = [{transform_indices = @transform_0, window_bounds = array<i64: 1, 4, 8, 8>}, {transform_indices = @transform_1, window_bounds = array<i64: 1, 4, 8, 8>}, {transform_indices = @transform_2, window_bounds = array<i64: 1, 4, 8, 8>}, {pipeline_mode = #tpu.pipeline_mode<synchronous>, transform_indices = @transform_3, window_bounds = array<i64: 1, 8, 8>}, {transform_indices = @transform_4, window_bounds = array<i64: 1, 4, 8, 8>}]} {
    %c0 = arith.constant 0 : index
    %c0_0 = arith.constant 0 : index
    %c0_1 = arith.constant 0 : index
    %c0_2 = arith.constant 0 : index
    %0 = vector.load %arg1[%c0, %c0_0, %c0_1, %c0_2] : memref<1x4x8x8xf32, #tpu.memory_space<vmem>>, vector<1x4x8x8xf32>
    %1 = vector.shape_cast %0 : vector<1x4x8x8xf32> to vector<4x8x8xf32>
    %cst = arith.constant 0.353553385 : f32
    %2 = vector.broadcast %cst : f32 to vector<4x8x8xf32>
    %3 = arith.mulf %1, %2 : vector<4x8x8xf32>
    %c0_3 = arith.constant 0 : index
    %c0_4 = arith.constant 0 : index
    %c0_5 = arith.constant 0 : index
    %c0_6 = arith.constant 0 : index
    %4 = vector.load %arg2[%c0_3, %c0_4, %c0_5, %c0_6] : memref<1x4x8x8xf32, #tpu.memory_space<vmem>>, vector<1x4x8x8xf32>
    %5 = vector.shape_cast %4 : vector<1x4x8x8xf32> to vector<4x8x8xf32>
    %c0_7 = arith.constant 0 : index
    %c0_8 = arith.constant 0 : index
    %c0_9 = arith.constant 0 : index
    %c0_10 = arith.constant 0 : index
    %6 = vector.load %arg3[%c0_7, %c0_8, %c0_9, %c0_10] : memref<1x4x8x8xf32, #tpu.memory_space<vmem>>, vector<1x4x8x8xf32>
    %7 = vector.shape_cast %6 : vector<1x4x8x8xf32> to vector<4x8x8xf32>
    %c0_11 = arith.constant 0 : index
    %c0_12 = arith.constant 0 : index
    %c0_13 = arith.constant 0 : index
    %8 = vector.load %arg4[%c0_11, %c0_12, %c0_13] : memref<1x8x8xi32, #tpu.memory_space<vmem>>, vector<1x8x8xi32>
    %9 = vector.shape_cast %8 : vector<1x8x8xi32> to vector<8x8xi32>
    %cst_14 = arith.constant dense<0.000000e+00> : vector<4x8x8xf32>
    %10 = tpu.matmul %3, %5, %cst_14 {dimension_numbers = #tpu.dot_dimension_numbers<[2], [2], [1], [1], [0, 0, 0, 1, 1, 1], [0], [0]>} : vector<4x8x8xf32>, vector<4x8x8xf32>, vector<4x8x8xf32> -> vector<4x8x8xf32>
    %11 = vector.shape_cast %9 : vector<8x8xi32> to vector<1x8x8xi32>
    %c0_i32 = arith.constant 0 : i32
    %12 = vector.broadcast %c0_i32 : i32 to vector<1x8x8xi32>
    %13 = arith.cmpi eq, %11, %12 : vector<1x8x8xi32>
    %cst_15 = arith.constant -1.000000e+09 : f32
    %14 = vector.shape_cast %13 : vector<1x8x8xi1> to vector<1x8x8xi1>
    %15 = vector.broadcast %14 : vector<1x8x8xi1> to vector<4x8x8xi1>
    %16 = vector.broadcast %cst_15 : f32 to vector<4x8x8xf32>
    %17 = arith.select %15, %16, %10 : vector<4x8x8xi1>, vector<4x8x8xf32>
    %cst_16 = arith.constant dense<0xFF800000> : vector<4x8xf32>
    %18 = vector.multi_reduction <maximumf>, %17, %cst_16 [2] : vector<4x8x8xf32> to vector<4x8xf32>
    %19 = vector.shape_cast %18 : vector<4x8xf32> to vector<4x8x1xf32>
    %20 = vector.broadcast %19 : vector<4x8x1xf32> to vector<4x8x8xf32>
    %21 = arith.subf %17, %20 : vector<4x8x8xf32>
    %22 = math.exp %21 : vector<4x8x8xf32>
    %cst_17 = arith.constant dense<0.000000e+00> : vector<4x8xf32>
    %23 = vector.multi_reduction <add>, %22, %cst_17 [2] : vector<4x8x8xf32> to vector<4x8xf32>
    %24 = vector.shape_cast %23 : vector<4x8xf32> to vector<4x8x1xf32>
    %25 = tpu.reciprocal %24 {approx = true} : vector<4x8x1xf32> -> vector<4x8x1xf32>
    %26 = vector.broadcast %25 : vector<4x8x1xf32> to vector<4x8x8xf32>
    %27 = arith.mulf %22, %26 : vector<4x8x8xf32>
    %cst_18 = arith.constant dense<0.000000e+00> : vector<4x8x8xf32>
    %28 = tpu.matmul %27, %7, %cst_18 {dimension_numbers = #tpu.dot_dimension_numbers<[2], [1], [1], [2], [0, 0, 0, 1, 1, 2], [0], [0]>} : vector<4x8x8xf32>, vector<4x8x8xf32>, vector<4x8x8xf32> -> vector<4x8x8xf32>
    %c0_19 = arith.constant 0 : index
    %c0_20 = arith.constant 0 : index
    %c0_21 = arith.constant 0 : index
    %c0_22 = arith.constant 0 : index
    %29 = vector.load %arg5[%c0_19, %c0_20, %c0_21, %c0_22] : memref<1x4x8x8xf32, #tpu.memory_space<vmem>>, vector<1x4x8x8xf32>
    %30 = vector.shape_cast %29 : vector<1x4x8x8xf32> to vector<4x8x8xf32>
    %31 = vector.shape_cast %28 : vector<4x8x8xf32> to vector<1x4x8x8xf32>
    tpu.vector_store %arg5[%c0_19, %c0_20, %c0_21, %c0_22], %31 {strides = array<i32>} : memref<1x4x8x8xf32, #tpu.memory_space<vmem>>, vector<1x4x8x8xf32>,
    return
  }
  func.func @transform_0(%arg0: i32) -> (i32, i32, i32, i32) {
    %c0_i32 = arith.constant 0 : i32
    %c0_i32_0 = arith.constant 0 : i32
    %c0_i32_1 = arith.constant 0 : i32
    %c0_i32_2 = arith.constant 0 : i32
    return %arg0, %c0_i32, %c0_i32_0, %c0_i32_1 : i32, i32, i32, i32
  }
  func.func @transform_1(%arg0: i32) -> (i32, i32, i32, i32) {
    %c0_i32 = arith.constant 0 : i32
    %c0_i32_0 = arith.constant 0 : i32
    %c0_i32_1 = arith.constant 0 : i32
    %c0_i32_2 = arith.constant 0 : i32
    return %arg0, %c0_i32, %c0_i32_0, %c0_i32_1 : i32, i32, i32, i32
  }
  func.func @transform_2(%arg0: i32) -> (i32, i32, i32, i32) {
    %c0_i32 = arith.constant 0 : i32
    %c0_i32_0 = arith.constant 0 : i32
    %c0_i32_1 = arith.constant 0 : i32
    %c0_i32_2 = arith.constant 0 : i32
    return %arg0, %c0_i32, %c0_i32_0, %c0_i32_1 : i32, i32, i32, i32
  }
  func.func @transform_3(%arg0: i32) -> (i32, i32, i32) {
    %c0_i32 = arith.constant 0 : i32
    %c0_i32_0 = arith.constant 0 : i32
    %c0_i32_1 = arith.constant 0 : i32
    %c0_i32_2 = arith.constant 0 : i32
    return %c0_i32, %c0_i32_0, %c0_i32_1 : i32, i32, i32
  }
  func.func @transform_4(%arg0: i32) -> (i32, i32, i32, i32) {
    %c0_i32 = arith.constant 0 : i32
    %c0_i32_0 = arith.constant 0 : i32
    %c0_i32_1 = arith.constant 0 : i32
    %c0_i32_2 = arith.constant 0 : i32
    return %arg0, %c0_i32, %c0_i32_0, %c0_i32_1 : i32, i32, i32, i32
  }
}

module attributes {stable_mosaic.version = 11 : i64} {
  func.func @_linear_kernel(%arg0: i32, %arg1: i32, %arg2: i32, %arg3: memref<16x32xf32, #tpu.memory_space<vmem>>, %arg4: memref<32x32xf32, #tpu.memory_space<vmem>>, %arg5: memref<1x32xf32, #tpu.memory_space<vmem>>, %arg6: memref<16x32xf32, #tpu.memory_space<vmem>>, %arg7: memref<16x32xf32, #tpu.memory_space<vmem>>, %arg8: memref<16x32xf32, #tpu.memory_space<vmem>>) attributes {dimension_semantics = [#tpu.dimension_semantics<parallel>, #tpu.dimension_semantics<parallel>, #tpu.dimension_semantics<arbitrary>], iteration_bounds = array<i64: 1, 1, 1>, scalar_prefetch = 0 : i64, scratch_operands = 1 : i64, tpu.core_type = #tpu.core_type<tc>, window_params = [{transform_indices = @transform_0, window_bounds = array<i64: 16, 32>}, {transform_indices = @transform_1, window_bounds = array<i64: 32, 32>}, {transform_indices = @transform_2, window_bounds = array<i64: 1, 32>}, {transform_indices = @transform_3, window_bounds = array<i64: 16, 32>}, {transform_indices = @transform_4, window_bounds = array<i64: 16, 32>}]} {
    %c0_i32 = arith.constant 0 : i32
    %0 = arith.cmpi eq, %arg2, %c0_i32 : i32
    %1 = arith.extui %0 : i1 to i32
    %c0_i32_0 = arith.constant 0 : i32
    %2 = arith.cmpi ne, %1, %c0_i32_0 : i32
    scf.if %2 {
      %cst_10 = arith.constant 0.000000e+00 : f32
      %12 = vector.broadcast %cst_10 : f32 to vector<16x32xf32>
      %c0_11 = arith.constant 0 : index
      %c0_12 = arith.constant 0 : index
      %13 = vector.load %arg8[%c0_11, %c0_12] : memref<16x32xf32, #tpu.memory_space<vmem>>, vector<16x32xf32>
      tpu.vector_store %arg8[%c0_11, %c0_12], %12 {strides = array<i32>} : memref<16x32xf32, #tpu.memory_space<vmem>>, vector<16x32xf32>,
    } else {
    }
    %c0 = arith.constant 0 : index
    %c0_1 = arith.constant 0 : index
    %3 = vector.load %arg8[%c0, %c0_1] : memref<16x32xf32, #tpu.memory_space<vmem>>, vector<16x32xf32>
    %c0_2 = arith.constant 0 : index
    %c0_3 = arith.constant 0 : index
    %4 = vector.load %arg3[%c0_2, %c0_3] : memref<16x32xf32, #tpu.memory_space<vmem>>, vector<16x32xf32>
    %c0_4 = arith.constant 0 : index
    %c0_5 = arith.constant 0 : index
    %5 = vector.load %arg4[%c0_4, %c0_5] : memref<32x32xf32, #tpu.memory_space<vmem>>, vector<32x32xf32>
    %cst = arith.constant dense<0.000000e+00> : vector<16x32xf32>
    %6 = tpu.matmul %4, %5, %cst {dimension_numbers = #tpu.dot_dimension_numbers<[1], [0], [0], [1], [0, 0, 1, 1], [], []>} : vector<16x32xf32>, vector<32x32xf32>, vector<16x32xf32> -> vector<16x32xf32>
    %7 = arith.addf %3, %6 : vector<16x32xf32>
    %c0_6 = arith.constant 0 : index
    %c0_7 = arith.constant 0 : index
    %8 = vector.load %arg8[%c0_6, %c0_7] : memref<16x32xf32, #tpu.memory_space<vmem>>, vector<16x32xf32>
    tpu.vector_store %arg8[%c0_6, %c0_7], %7 {strides = array<i32>} : memref<16x32xf32, #tpu.memory_space<vmem>>, vector<16x32xf32>,
    %c0_i32_8 = arith.constant 0 : i32
    %9 = arith.cmpi eq, %arg2, %c0_i32_8 : i32
    %10 = arith.extui %9 : i1 to i32
    %c0_i32_9 = arith.constant 0 : i32
    %11 = arith.cmpi ne, %10, %c0_i32_9 : i32
    scf.if %11 {
      %c0_10 = arith.constant 0 : index
      %c0_11 = arith.constant 0 : index
      %12 = vector.load %arg8[%c0_10, %c0_11] : memref<16x32xf32, #tpu.memory_space<vmem>>, vector<16x32xf32>
      %c0_12 = arith.constant 0 : index
      %c0_13 = arith.constant 0 : index
      %13 = vector.load %arg5[%c0_12, %c0_13] : memref<1x32xf32, #tpu.memory_space<vmem>>, vector<1x32xf32>
      %14 = vector.broadcast %13 : vector<1x32xf32> to vector<16x32xf32>
      %15 = arith.addf %12, %14 : vector<16x32xf32>
      %c0_14 = arith.constant 0 : index
      %c0_15 = arith.constant 0 : index
      %16 = vector.load %arg6[%c0_14, %c0_15] : memref<16x32xf32, #tpu.memory_space<vmem>>, vector<16x32xf32>
      %17 = arith.addf %15, %16 : vector<16x32xf32>
      %c0_16 = arith.constant 0 : index
      %c0_17 = arith.constant 0 : index
      %18 = vector.load %arg7[%c0_16, %c0_17] : memref<16x32xf32, #tpu.memory_space<vmem>>, vector<16x32xf32>
      tpu.vector_store %arg7[%c0_16, %c0_17], %17 {strides = array<i32>} : memref<16x32xf32, #tpu.memory_space<vmem>>, vector<16x32xf32>,
    } else {
    }
    return
  }
  func.func @transform_0(%arg0: i32, %arg1: i32, %arg2: i32) -> (i32, i32) {
    %c0_i32 = arith.constant 0 : i32
    return %arg0, %arg2 : i32, i32
  }
  func.func @transform_1(%arg0: i32, %arg1: i32, %arg2: i32) -> (i32, i32) {
    %c0_i32 = arith.constant 0 : i32
    return %arg2, %arg1 : i32, i32
  }
  func.func @transform_2(%arg0: i32, %arg1: i32, %arg2: i32) -> (i32, i32) {
    %c0_i32 = arith.constant 0 : i32
    %c0_i32_0 = arith.constant 0 : i32
    return %c0_i32, %arg1 : i32, i32
  }
  func.func @transform_3(%arg0: i32, %arg1: i32, %arg2: i32) -> (i32, i32) {
    %c0_i32 = arith.constant 0 : i32
    return %arg0, %arg1 : i32, i32
  }
  func.func @transform_4(%arg0: i32, %arg1: i32, %arg2: i32) -> (i32, i32) {
    %c0_i32 = arith.constant 0 : i32
    return %arg0, %arg1 : i32, i32
  }
}

module attributes {stable_mosaic.version = 11 : i64} {
  func.func @_ln_linear_kernel(%arg0: i32, %arg1: i32, %arg2: memref<16x32xf32, #tpu.memory_space<vmem>>, %arg3: memref<1x32xf32, #tpu.memory_space<vmem>>, %arg4: memref<1x32xf32, #tpu.memory_space<vmem>>, %arg5: memref<32x32xf32, #tpu.memory_space<vmem>>, %arg6: memref<1x32xf32, #tpu.memory_space<vmem>>, %arg7: memref<16x32xf32, #tpu.memory_space<vmem>>) attributes {dimension_semantics = [#tpu.dimension_semantics<parallel>, #tpu.dimension_semantics<parallel>], iteration_bounds = array<i64: 1, 1>, scalar_prefetch = 0 : i64, scratch_operands = 0 : i64, tpu.core_type = #tpu.core_type<tc>, window_params = [{transform_indices = @transform_0, window_bounds = array<i64: 16, 32>}, {pipeline_mode = #tpu.pipeline_mode<synchronous>, transform_indices = @transform_1, window_bounds = array<i64: 1, 32>}, {pipeline_mode = #tpu.pipeline_mode<synchronous>, transform_indices = @transform_2, window_bounds = array<i64: 1, 32>}, {transform_indices = @transform_3, window_bounds = array<i64: 32, 32>}, {transform_indices = @transform_4, window_bounds = array<i64: 1, 32>}, {transform_indices = @transform_5, window_bounds = array<i64: 16, 32>}]} {
    %c0 = arith.constant 0 : index
    %c0_0 = arith.constant 0 : index
    %0 = vector.load %arg2[%c0, %c0_0] : memref<16x32xf32, #tpu.memory_space<vmem>>, vector<16x32xf32>
    %c0_1 = arith.constant 0 : index
    %c0_2 = arith.constant 0 : index
    %1 = vector.load %arg3[%c0_1, %c0_2] : memref<1x32xf32, #tpu.memory_space<vmem>>, vector<1x32xf32>
    %c0_3 = arith.constant 0 : index
    %c0_4 = arith.constant 0 : index
    %2 = vector.load %arg4[%c0_3, %c0_4] : memref<1x32xf32, #tpu.memory_space<vmem>>, vector<1x32xf32>
    %cst = arith.constant dense<0.000000e+00> : vector<16xf32>
    %3 = vector.multi_reduction <add>, %0, %cst [1] : vector<16x32xf32> to vector<16xf32>
    %4 = vector.shape_cast %3 : vector<16xf32> to vector<16x1xf32>
    %cst_5 = arith.constant 3.200000e+01 : f32
    %5 = vector.broadcast %cst_5 : f32 to vector<16x1xf32>
    %6 = arith.divf %4, %5 : vector<16x1xf32>
    %7 = vector.broadcast %6 : vector<16x1xf32> to vector<16x32xf32>
    %8 = arith.subf %0, %7 : vector<16x32xf32>
    %9 = arith.mulf %8, %8 : vector<16x32xf32>
    %cst_6 = arith.constant dense<0.000000e+00> : vector<16xf32>
    %10 = vector.multi_reduction <add>, %9, %cst_6 [1] : vector<16x32xf32> to vector<16xf32>
    %11 = vector.shape_cast %10 : vector<16xf32> to vector<16x1xf32>
    %cst_7 = arith.constant 3.100000e+01 : f32
    %12 = vector.broadcast %cst_7 : f32 to vector<16x1xf32>
    %13 = arith.divf %11, %12 : vector<16x1xf32>
    %14 = math.sqrt %13 : vector<16x1xf32>
    %15 = vector.broadcast %1 : vector<1x32xf32> to vector<16x32xf32>
    %16 = arith.mulf %15, %8 : vector<16x32xf32>
    %cst_8 = arith.constant 9.99999997E-7 : f32
    %17 = vector.broadcast %cst_8 : f32 to vector<16x1xf32>
    %18 = arith.addf %14, %17 : vector<16x1xf32>
    %19 = vector.broadcast %18 : vector<16x1xf32> to vector<16x32xf32>
    %20 = arith.divf %16, %19 : vector<16x32xf32>
    %21 = vector.broadcast %2 : vector<1x32xf32> to vector<16x32xf32>
    %22 = arith.addf %20, %21 : vector<16x32xf32>
    %c0_9 = arith.constant 0 : index
    %c0_10 = arith.constant 0 : index
    %23 = vector.load %arg5[%c0_9, %c0_10] : memref<32x32xf32, #tpu.memory_space<vmem>>, vector<32x32xf32>
    %cst_11 = arith.constant dense<0.000000e+00> : vector<16x32xf32>
    %24 = tpu.matmul %22, %23, %cst_11 {dimension_numbers = #tpu.dot_dimension_numbers<[1], [0], [0], [1], [0, 0, 1, 1], [], []>} : vector<16x32xf32>, vector<32x32xf32>, vector<16x32xf32> -> vector<16x32xf32>
    %c0_12 = arith.constant 0 : index
    %c0_13 = arith.constant 0 : index
    %25 = vector.load %arg6[%c0_12, %c0_13] : memref<1x32xf32, #tpu.memory_space<vmem>>, vector<1x32xf32>
    %26 = vector.broadcast %25 : vector<1x32xf32> to vector<16x32xf32>
    %27 = arith.addf %24, %26 : vector<16x32xf32>
    %c0_14 = arith.constant 0 : index
    %c0_15 = arith.constant 0 : index
    %28 = vector.load %arg7[%c0_14, %c0_15] : memref<16x32xf32, #tpu.memory_space<vmem>>, vector<16x32xf32>
    tpu.vector_store %arg7[%c0_14, %c0_15], %27 {strides = array<i32>} : memref<16x32xf32, #tpu.memory_space<vmem>>, vector<16x32xf32>,
    return
  }
  func.func @transform_0(%arg0: i32, %arg1: i32) -> (i32, i32) {
    %c0_i32 = arith.constant 0 : i32
    %c0_i32_0 = arith.constant 0 : i32
    return %arg0, %c0_i32 : i32, i32
  }
  func.func @transform_1(%arg0: i32, %arg1: i32) -> (i32, i32) {
    %c0_i32 = arith.constant 0 : i32
    %c0_i32_0 = arith.constant 0 : i32
    %c0_i32_1 = arith.constant 0 : i32
    return %c0_i32, %c0_i32_0 : i32, i32
  }
  func.func @transform_2(%arg0: i32, %arg1: i32) -> (i32, i32) {
    %c0_i32 = arith.constant 0 : i32
    %c0_i32_0 = arith.constant 0 : i32
    %c0_i32_1 = arith.constant 0 : i32
    return %c0_i32, %c0_i32_0 : i32, i32
  }
  func.func @transform_3(%arg0: i32, %arg1: i32) -> (i32, i32) {
    %c0_i32 = arith.constant 0 : i32
    %c0_i32_0 = arith.constant 0 : i32
    return %c0_i32, %arg1 : i32, i32
  }
  func.func @transform_4(%arg0: i32, %arg1: i32) -> (i32, i32) {
    %c0_i32 = arith.constant 0 : i32
    %c0_i32_0 = arith.constant 0 : i32
    return %c0_i32, %arg1 : i32, i32
  }
  func.func @transform_5(%arg0: i32, %arg1: i32) -> (i32, i32) {
    %c0_i32 = arith.constant 0 : i32
    return %arg0, %arg1 : i32, i32
  }
}

module attributes {stable_mosaic.version = 11 : i64} {
  func.func @_linear_kernel(%arg0: i32, %arg1: i32, %arg2: i32, %arg3: memref<16x32xf32, #tpu.memory_space<vmem>>, %arg4: memref<32x64xf32, #tpu.memory_space<vmem>>, %arg5: memref<1x64xf32, #tpu.memory_space<vmem>>, %arg6: memref<16x64xf32, #tpu.memory_space<vmem>>, %arg7: memref<16x64xf32, #tpu.memory_space<vmem>>) attributes {dimension_semantics = [#tpu.dimension_semantics<parallel>, #tpu.dimension_semantics<parallel>, #tpu.dimension_semantics<arbitrary>], iteration_bounds = array<i64: 1, 1, 1>, scalar_prefetch = 0 : i64, scratch_operands = 1 : i64, tpu.core_type = #tpu.core_type<tc>, window_params = [{transform_indices = @transform_0, window_bounds = array<i64: 16, 32>}, {transform_indices = @transform_1, window_bounds = array<i64: 32, 64>}, {transform_indices = @transform_2, window_bounds = array<i64: 1, 64>}, {transform_indices = @transform_3, window_bounds = array<i64: 16, 64>}]} {
    %c0_i32 = arith.constant 0 : i32
    %0 = arith.cmpi eq, %arg2, %c0_i32 : i32
    %1 = arith.extui %0 : i1 to i32
    %c0_i32_0 = arith.constant 0 : i32
    %2 = arith.cmpi ne, %1, %c0_i32_0 : i32
    scf.if %2 {
      %cst_10 = arith.constant 0.000000e+00 : f32
      %12 = vector.broadcast %cst_10 : f32 to vector<16x64xf32>
      %c0_11 = arith.constant 0 : index
      %c0_12 = arith.constant 0 : index
      %13 = vector.load %arg7[%c0_11, %c0_12] : memref<16x64xf32, #tpu.memory_space<vmem>>, vector<16x64xf32>
      tpu.vector_store %arg7[%c0_11, %c0_12], %12 {strides = array<i32>} : memref<16x64xf32, #tpu.memory_space<vmem>>, vector<16x64xf32>,
    } else {
    }
    %c0 = arith.constant 0 : index
    %c0_1 = arith.constant 0 : index
    %3 = vector.load %arg7[%c0, %c0_1] : memref<16x64xf32, #tpu.memory_space<vmem>>, vector<16x64xf32>
    %c0_2 = arith.constant 0 : index
    %c0_3 = arith.constant 0 : index
    %4 = vector.load %arg3[%c0_2, %c0_3] : memref<16x32xf32, #tpu.memory_space<vmem>>, vector<16x32xf32>
    %c0_4 = arith.constant 0 : index
    %c0_5 = arith.constant 0 : index
    %5 = vector.load %arg4[%c0_4, %c0_5] : memref<32x64xf32, #tpu.memory_space<vmem>>, vector<32x64xf32>
    %cst = arith.constant dense<0.000000e+00> : vector<16x64xf32>
    %6 = tpu.matmul %4, %5, %cst {dimension_numbers = #tpu.dot_dimension_numbers<[1], [0], [0], [1], [0, 0, 1, 1], [], []>} : vector<16x32xf32>, vector<32x64xf32>, vector<16x64xf32> -> vector<16x64xf32>
    %7 = arith.addf %3, %6 : vector<16x64xf32>
    %c0_6 = arith.constant 0 : index
    %c0_7 = arith.constant 0 : index
    %8 = vector.load %arg7[%c0_6, %c0_7] : memref<16x64xf32, #tpu.memory_space<vmem>>, vector<16x64xf32>
    tpu.vector_store %arg7[%c0_6, %c0_7], %7 {strides = array<i32>} : memref<16x64xf32, #tpu.memory_space<vmem>>, vector<16x64xf32>,
    %c0_i32_8 = arith.constant 0 : i32
    %9 = arith.cmpi eq, %arg2, %c0_i32_8 : i32
    %10 = arith.extui %9 : i1 to i32
    %c0_i32_9 = arith.constant 0 : i32
    %11 = arith.cmpi ne, %10, %c0_i32_9 : i32
    scf.if %11 {
      %c0_10 = arith.constant 0 : index
      %c0_11 = arith.constant 0 : index
      %12 = vector.load %arg7[%c0_10, %c0_11] : memref<16x64xf32, #tpu.memory_space<vmem>>, vector<16x64xf32>
      %c0_12 = arith.constant 0 : index
      %c0_13 = arith.constant 0 : index
      %13 = vector.load %arg5[%c0_12, %c0_13] : memref<1x64xf32, #tpu.memory_space<vmem>>, vector<1x64xf32>
      %14 = vector.broadcast %13 : vector<1x64xf32> to vector<16x64xf32>
      %15 = arith.addf %12, %14 : vector<16x64xf32>
      %c0_14 = arith.constant 0 : index
      %c0_15 = arith.constant 0 : index
      %16 = vector.load %arg6[%c0_14, %c0_15] : memref<16x64xf32, #tpu.memory_space<vmem>>, vector<16x64xf32>
      tpu.vector_store %arg6[%c0_14, %c0_15], %15 {strides = array<i32>} : memref<16x64xf32, #tpu.memory_space<vmem>>, vector<16x64xf32>,
    } else {
    }
    return
  }
  func.func @transform_0(%arg0: i32, %arg1: i32, %arg2: i32) -> (i32, i32) {
    %c0_i32 = arith.constant 0 : i32
    return %arg0, %arg2 : i32, i32
  }
  func.func @transform_1(%arg0: i32, %arg1: i32, %arg2: i32) -> (i32, i32) {
    %c0_i32 = arith.constant 0 : i32
    return %arg2, %arg1 : i32, i32
  }
  func.func @transform_2(%arg0: i32, %arg1: i32, %arg2: i32) -> (i32, i32) {
    %c0_i32 = arith.constant 0 : i32
    %c0_i32_0 = arith.constant 0 : i32
    return %c0_i32, %arg1 : i32, i32
  }
  func.func @transform_3(%arg0: i32, %arg1: i32, %arg2: i32) -> (i32, i32) {
    %c0_i32 = arith.constant 0 : i32
    return %arg0, %arg1 : i32, i32
  }
}

module attributes {stable_mosaic.version = 11 : i64} {
  func.func @_layernorm_kernel(%arg0: i32, %arg1: memref<16x32xf32, #tpu.memory_space<vmem>>, %arg2: memref<1x32xf32, #tpu.memory_space<vmem>>, %arg3: memref<1x32xf32, #tpu.memory_space<vmem>>, %arg4: memref<16x32xf32, #tpu.memory_space<vmem>>) attributes {dimension_semantics = [#tpu.dimension_semantics<parallel>], iteration_bounds = array<i64: 1>, scalar_prefetch = 0 : i64, scratch_operands = 0 : i64, tpu.core_type = #tpu.core_type<tc>, window_params = [{transform_indices = @transform_0, window_bounds = array<i64: 16, 32>}, {pipeline_mode = #tpu.pipeline_mode<synchronous>, transform_indices = @transform_1, window_bounds = array<i64: 1, 32>}, {pipeline_mode = #tpu.pipeline_mode<synchronous>, transform_indices = @transform_2, window_bounds = array<i64: 1, 32>}, {transform_indices = @transform_3, window_bounds = array<i64: 16, 32>}]} {
    %c0 = arith.constant 0 : index
    %c0_0 = arith.constant 0 : index
    %0 = vector.load %arg1[%c0, %c0_0] : memref<16x32xf32, #tpu.memory_space<vmem>>, vector<16x32xf32>
    %c0_1 = arith.constant 0 : index
    %c0_2 = arith.constant 0 : index
    %1 = vector.load %arg2[%c0_1, %c0_2] : memref<1x32xf32, #tpu.memory_space<vmem>>, vector<1x32xf32>
    %c0_3 = arith.constant 0 : index
    %c0_4 = arith.constant 0 : index
    %2 = vector.load %arg3[%c0_3, %c0_4] : memref<1x32xf32, #tpu.memory_space<vmem>>, vector<1x32xf32>
    %cst = arith.constant dense<0.000000e+00> : vector<16xf32>
    %3 = vector.multi_reduction <add>, %0, %cst [1] : vector<16x32xf32> to vector<16xf32>
    %4 = vector.shape_cast %3 : vector<16xf32> to vector<16x1xf32>
    %cst_5 = arith.constant 3.200000e+01 : f32
    %5 = vector.broadcast %cst_5 : f32 to vector<16x1xf32>
    %6 = arith.divf %4, %5 : vector<16x1xf32>
    %7 = vector.broadcast %6 : vector<16x1xf32> to vector<16x32xf32>
    %8 = arith.subf %0, %7 : vector<16x32xf32>
    %9 = arith.mulf %8, %8 : vector<16x32xf32>
    %cst_6 = arith.constant dense<0.000000e+00> : vector<16xf32>
    %10 = vector.multi_reduction <add>, %9, %cst_6 [1] : vector<16x32xf32> to vector<16xf32>
    %11 = vector.shape_cast %10 : vector<16xf32> to vector<16x1xf32>
    %cst_7 = arith.constant 3.100000e+01 : f32
    %12 = vector.broadcast %cst_7 : f32 to vector<16x1xf32>
    %13 = arith.divf %11, %12 : vector<16x1xf32>
    %14 = math.sqrt %13 : vector<16x1xf32>
    %15 = vector.broadcast %1 : vector<1x32xf32> to vector<16x32xf32>
    %16 = arith.mulf %15, %8 : vector<16x32xf32>
    %cst_8 = arith.constant 9.99999997E-7 : f32
    %17 = vector.broadcast %cst_8 : f32 to vector<16x1xf32>
    %18 = arith.addf %14, %17 : vector<16x1xf32>
    %19 = vector.broadcast %18 : vector<16x1xf32> to vector<16x32xf32>
    %20 = arith.divf %16, %19 : vector<16x32xf32>
    %21 = vector.broadcast %2 : vector<1x32xf32> to vector<16x32xf32>
    %22 = arith.addf %20, %21 : vector<16x32xf32>
    %c0_9 = arith.constant 0 : index
    %c0_10 = arith.constant 0 : index
    %23 = vector.load %arg4[%c0_9, %c0_10] : memref<16x32xf32, #tpu.memory_space<vmem>>, vector<16x32xf32>
    tpu.vector_store %arg4[%c0_9, %c0_10], %22 {strides = array<i32>} : memref<16x32xf32, #tpu.memory_space<vmem>>, vector<16x32xf32>,
    return
  }
  func.func @transform_0(%arg0: i32) -> (i32, i32) {
    %c0_i32 = arith.constant 0 : i32
    %c0_i32_0 = arith.constant 0 : i32
    return %arg0, %c0_i32 : i32, i32
  }
  func.func @transform_1(%arg0: i32) -> (i32, i32) {
    %c0_i32 = arith.constant 0 : i32
    %c0_i32_0 = arith.constant 0 : i32
    %c0_i32_1 = arith.constant 0 : i32
    return %c0_i32, %c0_i32_0 : i32, i32
  }
  func.func @transform_2(%arg0: i32) -> (i32, i32) {
    %c0_i32 = arith.constant 0 : i32
    %c0_i32_0 = arith.constant 0 : i32
    %c0_i32_1 = arith.constant 0 : i32
    return %c0_i32, %c0_i32_0 : i32, i32
  }
  func.func @transform_3(%arg0: i32) -> (i32, i32) {
    %c0_i32 = arith.constant 0 : i32
    %c0_i32_0 = arith.constant 0 : i32
    return %arg0, %c0_i32 : i32, i32
  }
}

module attributes {stable_mosaic.version = 11 : i64} {
  func.func @_ln_ffn_kernel(%arg0: i32, %arg1: i32, %arg2: memref<16x32xf32, #tpu.memory_space<vmem>>, %arg3: memref<1x32xf32, #tpu.memory_space<vmem>>, %arg4: memref<1x32xf32, #tpu.memory_space<vmem>>, %arg5: memref<32x64xf32, #tpu.memory_space<vmem>>, %arg6: memref<1x64xf32, #tpu.memory_space<vmem>>, %arg7: memref<64x32xf32, #tpu.memory_space<vmem>>, %arg8: memref<1x32xf32, #tpu.memory_space<vmem>>, %arg9: memref<16x32xf32, #tpu.memory_space<vmem>>, %arg10: memref<16x32xf32, #tpu.memory_space<vmem>>, %arg11: memref<16x32xf32, #tpu.memory_space<vmem>>) attributes {dimension_semantics = [#tpu.dimension_semantics<parallel>, #tpu.dimension_semantics<arbitrary>], iteration_bounds = array<i64: 1, 1>, scalar_prefetch = 0 : i64, scratch_operands = 2 : i64, tpu.core_type = #tpu.core_type<tc>, window_params = [{transform_indices = @transform_0, window_bounds = array<i64: 16, 32>}, {pipeline_mode = #tpu.pipeline_mode<synchronous>, transform_indices = @transform_1, window_bounds = array<i64: 1, 32>}, {pipeline_mode = #tpu.pipeline_mode<synchronous>, transform_indices = @transform_2, window_bounds = array<i64: 1, 32>}, {transform_indices = @transform_3, window_bounds = array<i64: 32, 64>}, {transform_indices = @transform_4, window_bounds = array<i64: 1, 64>}, {transform_indices = @transform_5, window_bounds = array<i64: 64, 32>}, {pipeline_mode = #tpu.pipeline_mode<synchronous>, transform_indices = @transform_6, window_bounds = array<i64: 1, 32>}, {transform_indices = @transform_7, window_bounds = array<i64: 16, 32>}]} {
    %c0_i32 = arith.constant 0 : i32
    %0 = arith.cmpi eq, %arg1, %c0_i32 : i32
    %1 = arith.extui %0 : i1 to i32
    %c0_i32_0 = arith.constant 0 : i32
    %2 = arith.cmpi ne, %1, %c0_i32_0 : i32
    scf.if %2 {
      %c0_16 = arith.constant 0 : index
      %c0_17 = arith.constant 0 : index
      %19 = vector.load %arg2[%c0_16, %c0_17] : memref<16x32xf32, #tpu.memory_space<vmem>>, vector<16x32xf32>
      %c0_18 = arith.constant 0 : index
      %c0_19 = arith.constant 0 : index
      %20 = vector.load %arg3[%c0_18, %c0_19] : memref<1x32xf32, #tpu.memory_space<vmem>>, vector<1x32xf32>
      %c0_20 = arith.constant 0 : index
      %c0_21 = arith.constant 0 : index
      %21 = vector.load %arg4[%c0_20, %c0_21] : memref<1x32xf32, #tpu.memory_space<vmem>>, vector<1x32xf32>
      %cst_22 = arith.constant dense<0.000000e+00> : vector<16xf32>
      %22 = vector.multi_reduction <add>, %19, %cst_22 [1] : vector<16x32xf32> to vector<16xf32>
      %23 = vector.shape_cast %22 : vector<16xf32> to vector<16x1xf32>
      %cst_23 = arith.constant 3.200000e+01 : f32
      %24 = vector.broadcast %cst_23 : f32 to vector<16x1xf32>
      %25 = arith.divf %23, %24 : vector<16x1xf32>
      %26 = vector.broadcast %25 : vector<16x1xf32> to vector<16x32xf32>
      %27 = arith.subf %19, %26 : vector<16x32xf32>
      %28 = arith.mulf %27, %27 : vector<16x32xf32>
      %cst_24 = arith.constant dense<0.000000e+00> : vector<16xf32>
      %29 = vector.multi_reduction <add>, %28, %cst_24 [1] : vector<16x32xf32> to vector<16xf32>
      %30 = vector.shape_cast %29 : vector<16xf32> to vector<16x1xf32>
      %cst_25 = arith.constant 3.100000e+01 : f32
      %31 = vector.broadcast %cst_25 : f32 to vector<16x1xf32>
      %32 = arith.divf %30, %31 : vector<16x1xf32>
      %33 = math.sqrt %32 : vector<16x1xf32>
      %34 = vector.broadcast %20 : vector<1x32xf32> to vector<16x32xf32>
      %35 = arith.mulf %34, %27 : vector<16x32xf32>
      %cst_26 = arith.constant 9.99999997E-7 : f32
      %36 = vector.broadcast %cst_26 : f32 to vector<16x1xf32>
      %37 = arith.addf %33, %36 : vector<16x1xf32>
      %38 = vector.broadcast %37 : vector<16x1xf32> to vector<16x32xf32>
      %39 = arith.divf %35, %38 : vector<16x32xf32>
      %40 = vector.broadcast %21 : vector<1x32xf32> to vector<16x32xf32>
      %41 = arith.addf %39, %40 : vector<16x32xf32>
      %c0_27 = arith.constant 0 : index
      %c0_28 = arith.constant 0 : index
      %42 = vector.load %arg10[%c0_27, %c0_28] : memref<16x32xf32, #tpu.memory_space<vmem>>, vector<16x32xf32>
      tpu.vector_store %arg10[%c0_27, %c0_28], %41 {strides = array<i32>} : memref<16x32xf32, #tpu.memory_space<vmem>>, vector<16x32xf32>,
      %cst_29 = arith.constant 0.000000e+00 : f32
      %43 = vector.broadcast %cst_29 : f32 to vector<16x32xf32>
      %c0_30 = arith.constant 0 : index
      %c0_31 = arith.constant 0 : index
      %44 = vector.load %arg11[%c0_30, %c0_31] : memref<16x32xf32, #tpu.memory_space<vmem>>, vector<16x32xf32>
      tpu.vector_store %arg11[%c0_30, %c0_31], %43 {strides = array<i32>} : memref<16x32xf32, #tpu.memory_space<vmem>>, vector<16x32xf32>,
    } else {
    }
    %c0 = arith.constant 0 : index
    %c0_1 = arith.constant 0 : index
    %3 = vector.load %arg10[%c0, %c0_1] : memref<16x32xf32, #tpu.memory_space<vmem>>, vector<16x32xf32>
    %c0_2 = arith.constant 0 : index
    %c0_3 = arith.constant 0 : index
    %4 = vector.load %arg5[%c0_2, %c0_3] : memref<32x64xf32, #tpu.memory_space<vmem>>, vector<32x64xf32>
    %cst = arith.constant dense<0.000000e+00> : vector<16x64xf32>
    %5 = tpu.matmul %3, %4, %cst {dimension_numbers = #tpu.dot_dimension_numbers<[1], [0], [0], [1], [0, 0, 1, 1], [], []>} : vector<16x32xf32>, vector<32x64xf32>, vector<16x64xf32> -> vector<16x64xf32>
    %c0_4 = arith.constant 0 : index
    %c0_5 = arith.constant 0 : index
    %6 = vector.load %arg6[%c0_4, %c0_5] : memref<1x64xf32, #tpu.memory_space<vmem>>, vector<1x64xf32>
    %7 = vector.broadcast %6 : vector<1x64xf32> to vector<16x64xf32>
    %8 = arith.addf %5, %7 : vector<16x64xf32>
    %cst_6 = arith.constant 0.000000e+00 : f32
    %9 = vector.broadcast %cst_6 : f32 to vector<16x64xf32>
    %10 = arith.maximumf %8, %9 : vector<16x64xf32>
    %c0_7 = arith.constant 0 : index
    %c0_8 = arith.constant 0 : index
    %11 = vector.load %arg11[%c0_7, %c0_8] : memref<16x32xf32, #tpu.memory_space<vmem>>, vector<16x32xf32>
    %c0_9 = arith.constant 0 : index
    %c0_10 = arith.constant 0 : index
    %12 = vector.load %arg7[%c0_9, %c0_10] : memref<64x32xf32, #tpu.memory_space<vmem>>, vector<64x32xf32>
    %cst_11 = arith.constant dense<0.000000e+00> : vector<16x32xf32>
    %13 = tpu.matmul %10, %12, %cst_11 {dimension_numbers = #tpu.dot_dimension_numbers<[1], [0], [0], [1], [0, 0, 1, 1], [], []>} : vector<16x64xf32>, vector<64x32xf32>, vector<16x32xf32> -> vector<16x32xf32>
    %14 = arith.addf %11, %13 : vector<16x32xf32>
    %c0_12 = arith.constant 0 : index
    %c0_13 = arith.constant 0 : index
    %15 = vector.load %arg11[%c0_12, %c0_13] : memref<16x32xf32, #tpu.memory_space<vmem>>, vector<16x32xf32>
    tpu.vector_store %arg11[%c0_12, %c0_13], %14 {strides = array<i32>} : memref<16x32xf32, #tpu.memory_space<vmem>>, vector<16x32xf32>,
    %c0_i32_14 = arith.constant 0 : i32
    %16 = arith.cmpi eq, %arg1, %c0_i32_14 : i32
    %17 = arith.extui %16 : i1 to i32
    %c0_i32_15 = arith.constant 0 : i32
    %18 = arith.cmpi ne, %17, %c0_i32_15 : i32
    scf.if %18 {
      %c0_16 = arith.constant 0 : index
      %c0_17 = arith.constant 0 : index
      %19 = vector.load %arg2[%c0_16, %c0_17] : memref<16x32xf32, #tpu.memory_space<vmem>>, vector<16x32xf32>
      %c0_18 = arith.constant 0 : index
      %c0_19 = arith.constant 0 : index
      %20 = vector.load %arg11[%c0_18, %c0_19] : memref<16x32xf32, #tpu.memory_space<vmem>>, vector<16x32xf32>
      %21 = arith.addf %19, %20 : vector<16x32xf32>
      %c0_20 = arith.constant 0 : index
      %c0_21 = arith.constant 0 : index
      %22 = vector.load %arg8[%c0_20, %c0_21] : memref<1x32xf32, #tpu.memory_space<vmem>>, vector<1x32xf32>
      %23 = vector.broadcast %22 : vector<1x32xf32> to vector<16x32xf32>
      %24 = arith.addf %21, %23 : vector<16x32xf32>
      %c0_22 = arith.constant 0 : index
      %c0_23 = arith.constant 0 : index
      %25 = vector.load %arg9[%c0_22, %c0_23] : memref<16x32xf32, #tpu.memory_space<vmem>>, vector<16x32xf32>
      tpu.vector_store %arg9[%c0_22, %c0_23], %24 {strides = array<i32>} : memref<16x32xf32, #tpu.memory_space<vmem>>, vector<16x32xf32>,
    } else {
    }
    return
  }
  func.func @transform_0(%arg0: i32, %arg1: i32) -> (i32, i32) {
    %c0_i32 = arith.constant 0 : i32
    %c0_i32_0 = arith.constant 0 : i32
    return %arg0, %c0_i32 : i32, i32
  }
  func.func @transform_1(%arg0: i32, %arg1: i32) -> (i32, i32) {
    %c0_i32 = arith.constant 0 : i32
    %c0_i32_0 = arith.constant 0 : i32
    %c0_i32_1 = arith.constant 0 : i32
    return %c0_i32, %c0_i32_0 : i32, i32
  }
  func.func @transform_2(%arg0: i32, %arg1: i32) -> (i32, i32) {
    %c0_i32 = arith.constant 0 : i32
    %c0_i32_0 = arith.constant 0 : i32
    %c0_i32_1 = arith.constant 0 : i32
    return %c0_i32, %c0_i32_0 : i32, i32
  }
  func.func @transform_3(%arg0: i32, %arg1: i32) -> (i32, i32) {
    %c0_i32 = arith.constant 0 : i32
    %c0_i32_0 = arith.constant 0 : i32
    return %c0_i32, %arg1 : i32, i32
  }
  func.func @transform_4(%arg0: i32, %arg1: i32) -> (i32, i32) {
    %c0_i32 = arith.constant 0 : i32
    %c0_i32_0 = arith.constant 0 : i32
    return %c0_i32, %arg1 : i32, i32
  }
  func.func @transform_5(%arg0: i32, %arg1: i32) -> (i32, i32) {
    %c0_i32 = arith.constant 0 : i32
    %c0_i32_0 = arith.constant 0 : i32
    return %arg1, %c0_i32 : i32, i32
  }
  func.func @transform_6(%arg0: i32, %arg1: i32) -> (i32, i32) {
    %c0_i32 = arith.constant 0 : i32
    %c0_i32_0 = arith.constant 0 : i32
    %c0_i32_1 = arith.constant 0 : i32
    return %c0_i32, %c0_i32_0 : i32, i32
  }
  func.func @transform_7(%arg0: i32, %arg1: i32) -> (i32, i32) {
    %c0_i32 = arith.constant 0 : i32
    %c0_i32_0 = arith.constant 0 : i32
    return %arg0, %c0_i32 : i32, i32
  }
}

module attributes {stable_mosaic.version = 11 : i64} {
  func.func @_attention_kernel(%arg0: i32, %arg1: memref<1x4x8x8xf32, #tpu.memory_space<vmem>>, %arg2: memref<1x4x8x8xf32, #tpu.memory_space<vmem>>, %arg3: memref<1x4x8x8xf32, #tpu.memory_space<vmem>>, %arg4: memref<1x1x8xi32, #tpu.memory_space<vmem>>, %arg5: memref<1x4x8x8xf32, #tpu.memory_space<vmem>>) attributes {dimension_semantics = [#tpu.dimension_semantics<parallel>], iteration_bounds = array<i64: 2>, scalar_prefetch = 0 : i64, scratch_operands = 0 : i64, tpu.core_type = #tpu.core_type<tc>, window_params = [{transform_indices = @transform_0, window_bounds = array<i64: 1, 4, 8, 8>}, {transform_indices = @transform_1, window_bounds = array<i64: 1, 4, 8, 8>}, {transform_indices = @transform_2, window_bounds = array<i64: 1, 4, 8, 8>}, {pipeline_mode = #tpu.pipeline_mode<synchronous>, transform_indices = @transform_3, window_bounds = array<i64: 1, 1, 8>}, {transform_indices = @transform_4, window_bounds = array<i64: 1, 4, 8, 8>}]} {
    %c0 = arith.constant 0 : index
    %c0_0 = arith.constant 0 : index
    %c0_1 = arith.constant 0 : index
    %c0_2 = arith.constant 0 : index
    %0 = vector.load %arg1[%c0, %c0_0, %c0_1, %c0_2] : memref<1x4x8x8xf32, #tpu.memory_space<vmem>>, vector<1x4x8x8xf32>
    %1 = vector.shape_cast %0 : vector<1x4x8x8xf32> to vector<4x8x8xf32>
    %cst = arith.constant 0.353553385 : f32
    %2 = vector.broadcast %cst : f32 to vector<4x8x8xf32>
    %3 = arith.mulf %1, %2 : vector<4x8x8xf32>
    %c0_3 = arith.constant 0 : index
    %c0_4 = arith.constant 0 : index
    %c0_5 = arith.constant 0 : index
    %c0_6 = arith.constant 0 : index
    %4 = vector.load %arg2[%c0_3, %c0_4, %c0_5, %c0_6] : memref<1x4x8x8xf32, #tpu.memory_space<vmem>>, vector<1x4x8x8xf32>
    %5 = vector.shape_cast %4 : vector<1x4x8x8xf32> to vector<4x8x8xf32>
    %c0_7 = arith.constant 0 : index
    %c0_8 = arith.constant 0 : index
    %c0_9 = arith.constant 0 : index
    %c0_10 = arith.constant 0 : index
    %6 = vector.load %arg3[%c0_7, %c0_8, %c0_9, %c0_10] : memref<1x4x8x8xf32, #tpu.memory_space<vmem>>, vector<1x4x8x8xf32>
    %7 = vector.shape_cast %6 : vector<1x4x8x8xf32> to vector<4x8x8xf32>
    %c0_11 = arith.constant 0 : index
    %c0_12 = arith.constant 0 : index
    %c0_13 = arith.constant 0 : index
    %8 = vector.load %arg4[%c0_11, %c0_12, %c0_13] : memref<1x1x8xi32, #tpu.memory_space<vmem>>, vector<1x1x8xi32>
    %9 = vector.shape_cast %8 : vector<1x1x8xi32> to vector<1x8xi32>
    %cst_14 = arith.constant dense<0.000000e+00> : vector<4x8x8xf32>
    %10 = tpu.matmul %3, %5, %cst_14 {dimension_numbers = #tpu.dot_dimension_numbers<[2], [2], [1], [1], [0, 0, 0, 1, 1, 1], [0], [0]>} : vector<4x8x8xf32>, vector<4x8x8xf32>, vector<4x8x8xf32> -> vector<4x8x8xf32>
    %11 = vector.shape_cast %9 : vector<1x8xi32> to vector<1x1x8xi32>
    %c0_i32 = arith.constant 0 : i32
    %12 = vector.broadcast %c0_i32 : i32 to vector<1x1x8xi32>
    %13 = arith.cmpi eq, %11, %12 : vector<1x1x8xi32>
    %cst_15 = arith.constant -1.000000e+09 : f32
    %14 = vector.shape_cast %13 : vector<1x1x8xi1> to vector<1x1x8xi1>
    %15 = vector.broadcast %14 : vector<1x1x8xi1> to vector<4x8x8xi1>
    %16 = vector.broadcast %cst_15 : f32 to vector<4x8x8xf32>
    %17 = arith.select %15, %16, %10 : vector<4x8x8xi1>, vector<4x8x8xf32>
    %cst_16 = arith.constant dense<0xFF800000> : vector<4x8xf32>
    %18 = vector.multi_reduction <maximumf>, %17, %cst_16 [2] : vector<4x8x8xf32> to vector<4x8xf32>
    %19 = vector.shape_cast %18 : vector<4x8xf32> to vector<4x8x1xf32>
    %20 = vector.broadcast %19 : vector<4x8x1xf32> to vector<4x8x8xf32>
    %21 = arith.subf %17, %20 : vector<4x8x8xf32>
    %22 = math.exp %21 : vector<4x8x8xf32>
    %cst_17 = arith.constant dense<0.000000e+00> : vector<4x8xf32>
    %23 = vector.multi_reduction <add>, %22, %cst_17 [2] : vector<4x8x8xf32> to vector<4x8xf32>
    %24 = vector.shape_cast %23 : vector<4x8xf32> to vector<4x8x1xf32>
    %25 = tpu.reciprocal %24 {approx = true} : vector<4x8x1xf32> -> vector<4x8x1xf32>
    %26 = vector.broadcast %25 : vector<4x8x1xf32> to vector<4x8x8xf32>
    %27 = arith.mulf %22, %26 : vector<4x8x8xf32>
    %cst_18 = arith.constant dense<0.000000e+00> : vector<4x8x8xf32>
    %28 = tpu.matmul %27, %7, %cst_18 {dimension_numbers = #tpu.dot_dimension_numbers<[2], [1], [1], [2], [0, 0, 0, 1, 1, 2], [0], [0]>} : vector<4x8x8xf32>, vector<4x8x8xf32>, vector<4x8x8xf32> -> vector<4x8x8xf32>
    %c0_19 = arith.constant 0 : index
    %c0_20 = arith.constant 0 : index
    %c0_21 = arith.constant 0 : index
    %c0_22 = arith.constant 0 : index
    %29 = vector.load %arg5[%c0_19, %c0_20, %c0_21, %c0_22] : memref<1x4x8x8xf32, #tpu.memory_space<vmem>>, vector<1x4x8x8xf32>
    %30 = vector.shape_cast %29 : vector<1x4x8x8xf32> to vector<4x8x8xf32>
    %31 = vector.shape_cast %28 : vector<4x8x8xf32> to vector<1x4x8x8xf32>
    tpu.vector_store %arg5[%c0_19, %c0_20, %c0_21, %c0_22], %31 {strides = array<i32>} : memref<1x4x8x8xf32, #tpu.memory_space<vmem>>, vector<1x4x8x8xf32>,
    return
  }
  func.func @transform_0(%arg0: i32) -> (i32, i32, i32, i32) {
    %c0_i32 = arith.constant 0 : i32
    %c0_i32_0 = arith.constant 0 : i32
    %c0_i32_1 = arith.constant 0 : i32
    %c0_i32_2 = arith.constant 0 : i32
    return %arg0, %c0_i32, %c0_i32_0, %c0_i32_1 : i32, i32, i32, i32
  }
  func.func @transform_1(%arg0: i32) -> (i32, i32, i32, i32) {
    %c0_i32 = arith.constant 0 : i32
    %c0_i32_0 = arith.constant 0 : i32
    %c0_i32_1 = arith.constant 0 : i32
    %c0_i32_2 = arith.constant 0 : i32
    return %arg0, %c0_i32, %c0_i32_0, %c0_i32_1 : i32, i32, i32, i32
  }
  func.func @transform_2(%arg0: i32) -> (i32, i32, i32, i32) {
    %c0_i32 = arith.constant 0 : i32
    %c0_i32_0 = arith.constant 0 : i32
    %c0_i32_1 = arith.constant 0 : i32
    %c0_i32_2 = arith.constant 0 : i32
    return %arg0, %c0_i32, %c0_i32_0, %c0_i32_1 : i32, i32, i32, i32
  }
  func.func @transform_3(%arg0: i32) -> (i32, i32, i32) {
    %c0_i32 = arith.constant 0 : i32
    %c0_i32_0 = arith.constant 0 : i32
    %c0_i32_1 = arith.constant 0 : i32
    %c0_i32_2 = arith.constant 0 : i32
    return %c0_i32, %c0_i32_0, %c0_i32_1 : i32, i32, i32
  }
  func.func @transform_4(%arg0: i32) -> (i32, i32, i32, i32) {
    %c0_i32 = arith.constant 0 : i32
    %c0_i32_0 = arith.constant 0 : i32
    %c0_i32_1 = arith.constant 0 : i32
    %c0_i32_2 = arith.constant 0 : i32
    return %arg0, %c0_i32, %c0_i32_0, %c0_i32_1 : i32, i32, i32, i32
  }
}

</mosaic_0001>

<bundles_post_ra>
// kernel: decoder_forward.17
= control target key start
LH: loop header
LB: loop body
LE: loop exit
PB: predicated region body
PF: predicated region fallthrough
CT: control target
= control target key end

     0   :  { %vm24_vm0 = vcmask 261120   ;;  %vm175_vm5 = vcmask 785408   ;;  %s281_s0 = inlined_call_operand.vmem [shape: f32[16,32], index: 0, kind: input, shape index: {}]   ;;  %s282_s3 = inlined_call_operand.vmem [shape: f32[32,96], index: 3, kind: input, shape index: {}]   ;;  %s283_s1 = inlined_call_operand.vmem [shape: f32[1,32], index: 1, kind: input, shape index: {}]   ;;  %s284_s2 = inlined_call_operand.vmem [shape: f32[1,32], index: 2, kind: input, shape index: {}]   ;;  %s285_s4 = inlined_call_operand.vmem [shape: f32[1,96], index: 4, kind: input, shape index: {}]   ;;  %s286_s5 = inlined_call_operand.vmem [shape: f32[16,96], index: 5, kind: output, shape index: {}]  }
   0x1   :  { %v20_v0 = vld [vmem:[%s281_s0] sm:$0xff]  ;;  %v21_v1 = vld [vmem:[%s281_s0 + $0x8] sm:$0xff]  ;;  %v86_v14 = vld [vmem:[%s282_s3 + $0x18] sm:$0xff] }
   0x2   :  { %v25_v2 = vsel %vm24_vm0, %v20_v0, 0.0  ;;  %v28_v3 = vsel %vm24_vm0, %v21_v1, 0.0  ;;  %v85_v15 = vld [vmem:[%s282_s3 + $0x10] sm:$0xff]  ;;  %193 = vmatprep.subr.mxu0 %v86_v14  ;;  %v84_v16 = vld [vmem:[%s282_s3 + $0x8] sm:$0xff]  ;;  %v83_v17 = vld [vmem:[%s282_s3] sm:$0xff] }
   0x3   :  { %26 = vadd.xlane.f32.xlu0 %v25_v2  ;;  %194 = vmatpush3.msra.mxu0 %v86_v14  ;;  %v182_v34 = vld [vmem:[%s283_s1] ss:$0 sm:$0xff] }
   0x4   :  { %195 = vmatprep.subr.mxu0 %v85_v15  ;;  %v183_v37 = vld [vmem:[%s284_s2] ss:$0 sm:$0xff] }
   0x5   :  { %196 = vmatpush3.msra.mxu0 %v85_v15  ;;  %v184_v44 = vld [vmem:[%s285_s4] ss:$0 sm:$0xff] }
   0x6   :  { %197 = vmatprep.subr.mxu0 %v84_v16 }
   0x7   :  { %29 = vadd.xlane.f32.xlu0 %v28_v3  ;;  %198 = vmatpush3.msra.mxu0 %v84_v16 }
   0x8   :  { %199 = vmatprep.subr.mxu0 %v83_v17 }
   0x9   :  { %200 = vmatpush3.msra.mxu0 %v83_v17 }
  0x8c   :  { %v27_v4 = vpop.xlane.xlu0 %26 }
  0x8d   :  { %v32_v5 = vmul.f32 0.03125, %v27_v4 }
  0x8f   :  { %v34_v6 = vsub.f32 %v20_v0, %v32_v5 }
  0x90   :  { %v30_v7 = vpop.xlane.xlu0 %29 }
  0x91   :  { %v33_v8 = vmul.f32 0.03125, %v30_v7  ;;  %v36_v9 = vmul.f32 %v34_v6, %v34_v6  ;;  %v67_v35 = vmul.f32 %v182_v34, %v34_v6 }
  0x93   :  { %v35_v10 = vsub.f32 %v21_v1, %v33_v8  ;;  %v38_v11 = vsel %vm24_vm0, %v36_v9, 0.0 }
  0x94   :  { %39 = vadd.xlane.f32.xlu1 %v38_v11 }
  0x95   :  { %v37_v12 = vmul.f32 %v35_v10, %v35_v10  ;;  %v68_v39 = vmul.f32 %v182_v34, %v35_v10 }
  0x97   :  { %v41_v13 = vsel %vm24_vm0, %v37_v12, 0.0 }
  0x98   :  { %42 = vadd.xlane.f32.xlu1 %v41_v13 }
 0x11d   :  { %v40_v18 = vpop.xlane.xlu1 %39 }
 0x11e   :  { %v45_v19 = vmul.f32 0.032258064, %v40_v18 }
 0x120   :  { %204 = vrsqrt.f32 %v45_v19  ;;  %vm49_vm1 = vcmp.eq.f32.partialorder %v45_v19, inf  ;;  %v52_v24 = vand.u32 2147483648, %v45_v19  ;;  %vm51_vm2 = vcmp.eq.f32.partialorder %v45_v19, 0.0 }
 0x121   :  { %v43_v20 = vpop.xlane.xlu1 %42 }
 0x122   :  { %v46_v21 = vmul.f32 0.032258064, %v43_v20 }
 0x124   :  { %206 = vrsqrt.f32 %v46_v21  ;;  %vm56_vm3 = vcmp.eq.f32.partialorder %v46_v21, inf  ;;  %v59_v30 = vand.u32 2147483648, %v46_v21  ;;  %vm58_vm4 = vcmp.eq.f32.partialorder %v46_v21, 0.0 }
 0x12d   :  { %v205_v22 = vpop.eup %204 }
 0x12e   :  { %v48_v23 = vmul.f32 %v205_v22, %v45_v19 }
 0x130   :  { %v50_v25 = vsel %vm49_vm1, %v45_v19, %v48_v23 }
 0x131   :  { %v207_v26 = vpop.eup %206  ;;  %v53_v27 = vsel %vm51_vm2, %v52_v24, %v50_v25 }
 0x132   :  { %v55_v28 = vmul.f32 %v207_v26, %v46_v21  ;;  %v69_v29 = vadd.f32 1e-06, %v53_v27 }
 0x134   :  { %v57_v31 = vsel %vm56_vm3, %v46_v21, %v55_v28  ;;  %208 = vrcp.f32 %v69_v29 }
 0x135   :  { %v60_v32 = vsel %vm58_vm4, %v59_v30, %v57_v31 }
 0x136   :  { %v70_v33 = vadd.f32 1e-06, %v60_v32 }
 0x138   :  { %210 = vrcp.f32 %v70_v33 }
 0x141   :  { %v209_v36 = vpop.eup %208 }
 0x142   :  { %v72_v38 = vmul.f32 %v209_v36, %v67_v35 }
 0x144   :  { %v81_v40 = vadd.f32 %v183_v37, %v72_v38 }
 0x145   :  { %v211_v41 = vpop.eup %210 }
 0x146   :  { %v74_v42 = vmul.f32 %v211_v41, %v68_v39  ;;  %201 = vmatprep.mubr.msk.f32.mxu0 %vm24_vm0, %v81_v40 }
 0x148   :  { %v82_v43 = vadd.f32 %v183_v37, %v74_v42 }
 0x14a   :  { %202 = vmatmul.mubr.msk.f32.vlgmr.msra.gmra.mxu0 %vm24_vm0, %v82_v43 }
 0x20a   :  { %v203_v45 = vpop.f32.mrf.mxu0 }
 0x20b   :  { %v172_v46 = vadd.f32 %v203_v45, %v184_v44 }
 0x20c   :  { %v166_v47 = vpop.f32.mrf.mxu0 }
 0x20d   :  { %177 = vst.msk [vmem:[%s286_s5 + $0x8] sm:$0xff] %vm175_vm5, %v172_v46  ;;  %v167_v48 = vadd.f32 %v184_v44, %v166_v47 }
 0x20f   :  { %176 = vst.msk [vmem:[%s286_s5] sm:$0xff] %vm175_vm5, %v167_v48 }

// kernel: decoder_forward.19
= control target key start
LH: loop header
LB: loop body
LE: loop exit
PB: predicated region body
PF: predicated region fallthrough
CT: control target
= control target key end

     0   :  { %vm21_vm0 = vcmask 261120   ;;  %v163_v2 = vmov 0.0   ;;  %s230_s1 = inlined_call_operand.vmem [shape: f32[32,32], index: 1, kind: input, shape index: {}]   ;;  %s231_s0 = inlined_call_operand.vmem [shape: f32[16,32], index: 0, kind: input, shape index: {}]   ;;  %s232_s2 = inlined_call_operand.vmem [shape: f32[1,32], index: 2, kind: input, shape index: {}]   ;;  %s233_s3 = inlined_call_operand.vmem [shape: f32[16,32], index: 3, kind: input, shape index: {}]   ;;  %s234_s4 = inlined_call_operand.vmem [shape: f32[16,32], index: 4, kind: output, shape index: {}]  }
   0x1   :  { %v31_v0 = vld [vmem:[%s230_s1 + $0x18] sm:$0xff]  ;;  %v30_v1 = vld [vmem:[%s230_s1 + $0x10] sm:$0xff]  ;;  %23 = vst.msk [vmem:[#allocation2 + $0x8] sm:$0xff] %vm21_vm0, %v163_v2  ;;  %22 = vst.msk [vmem:[#allocation2] sm:$0xff] %vm21_vm0, %v163_v2 }
   0x2   :  { %151 = vmatprep.subr.mxu0 %v31_v0  ;;  %v26_v3 = vld [vmem:[%s231_s0] sm:$0xff]  ;;  %v29_v4 = vld [vmem:[%s230_s1 + $0x8] sm:$0xff] }
   0x3   :  { %152 = vmatpush3.msra.mxu0 %v31_v0  ;;  %159 = vmatprep.mubr.msk.f32.mxu0 %vm21_vm0, %v26_v3  ;;  %v28_v5 = vld [vmem:[%s230_s1] sm:$0xff]  ;;  %v27_v6 = vld [vmem:[%s231_s0 + $0x8] sm:$0xff] }
   0x4   :  { %153 = vmatprep.subr.mxu0 %v30_v1  ;;  %v144_v13 = vld [vmem:[%s232_s2] ss:$0 sm:$0xff]  ;;  %v133_v15 = vld [vmem:[%s233_s3 + $0x8] sm:$0xff] }
   0x5   :  { %154 = vmatpush3.msra.mxu0 %v30_v1  ;;  %v132_v18 = vld [vmem:[%s233_s3] sm:$0xff] }
   0x6   :  { %155 = vmatprep.subr.mxu0 %v29_v4 }
   0x7   :  { %156 = vmatpush3.msra.mxu0 %v29_v4 }
   0x8   :  { %157 = vmatprep.subr.mxu0 %v28_v5  ;;  %v25_v7 = vld [vmem:[#allocation2 + $0x8] sm:$0xff]  ;;  %v24_v9 = vld [vmem:[#allocation2] sm:$0xff] }
   0x9   :  { %158 = vmatpush3.msra.mxu0 %v28_v5 }
   0xa   :  { %160 = vmatmul.mubr.msk.f32.vlgmr.msra.gmra.mxu0 %vm21_vm0, %v27_v6 }
  0xca   :  { %v161_v8 = vpop.f32.mrf.mxu0 }
  0xcb   :  { %v115_v10 = vadd.f32 %v161_v8, %v25_v7 }
  0xcc   :  { %v105_v11 = vpop.f32.mrf.mxu0 }
  0xcd   :  { %117 = vst.msk [vmem:[#allocation2 + $0x8] sm:$0xff] %vm21_vm0, %v115_v10  ;;  %v114_v12 = vadd.f32 %v105_v11, %v24_v9 }
  0xcf   :  { %116 = vst.msk [vmem:[#allocation2] sm:$0xff] %vm21_vm0, %v114_v12 }
  0xd4   :  { %v122_v14 = vld [vmem:[#allocation2 + $0x8] sm:$0xff] }
  0xd5   :  { %v131_v16 = vadd.f32 %v144_v13, %v122_v14 }
  0xd6   :  { %v121_v17 = vld [vmem:[#allocation2] sm:$0xff] }
  0xd7   :  { %v135_v19 = vadd.f32 %v133_v15, %v131_v16  ;;  %v130_v20 = vadd.f32 %v144_v13, %v121_v17 }
  0xd9   :  { %137 = vst.msk [vmem:[%s234_s4 + $0x8] sm:$0xff] %vm21_vm0, %v135_v19  ;;  %v134_v21 = vadd.f32 %v132_v18, %v130_v20 }
  0xdb   :  { %136 = vst.msk [vmem:[%s234_s4] sm:$0xff] %vm21_vm0, %v134_v21 }

// kernel: decoder_forward.20
= control target key start
LH: loop header
LB: loop body
LE: loop exit
PB: predicated region body
PF: predicated region fallthrough
CT: control target
= control target key end

     0   :  { %vm24_vm0 = vcmask 261120   ;;  %s282_s0 = inlined_call_operand.vmem [shape: f32[16,32], index: 0, kind: input, shape index: {}]   ;;  %s283_s3 = inlined_call_operand.vmem [shape: f32[32,32], index: 3, kind: input, shape index: {}]   ;;  %s284_s1 = inlined_call_operand.vmem [shape: f32[1,32], index: 1, kind: input, shape index: {}]   ;;  %s285_s2 = inlined_call_operand.vmem [shape: f32[1,32], index: 2, kind: input, shape index: {}]   ;;  %s286_s4 = inlined_call_operand.vmem [shape: f32[1,32], index: 4, kind: input, shape index: {}]   ;;  %s287_s5 = inlined_call_operand.vmem [shape: f32[16,32], index: 5, kind: output, shape index: {}]  }
   0x1   :  { %v20_v0 = vld [vmem:[%s282_s0] sm:$0xff]  ;;  %v21_v1 = vld [vmem:[%s282_s0 + $0x8] sm:$0xff]  ;;  %v86_v14 = vld [vmem:[%s283_s3 + $0x18] sm:$0xff] }
   0x2   :  { %v25_v2 = vsel %vm24_vm0, %v20_v0, 0.0  ;;  %v28_v3 = vsel %vm24_vm0, %v21_v1, 0.0  ;;  %v85_v15 = vld [vmem:[%s283_s3 + $0x10] sm:$0xff]  ;;  %192 = vmatprep.subr.mxu0 %v86_v14  ;;  %v84_v16 = vld [vmem:[%s283_s3 + $0x8] sm:$0xff]  ;;  %v83_v17 = vld [vmem:[%s283_s3] sm:$0xff] }
   0x3   :  { %26 = vadd.xlane.f32.xlu0 %v25_v2  ;;  %193 = vmatpush3.msra.mxu0 %v86_v14  ;;  %v181_v34 = vld [vmem:[%s284_s1] ss:$0 sm:$0xff] }
   0x4   :  { %194 = vmatprep.subr.mxu0 %v85_v15  ;;  %v182_v37 = vld [vmem:[%s285_s2] ss:$0 sm:$0xff] }
   0x5   :  { %195 = vmatpush3.msra.mxu0 %v85_v15  ;;  %v183_v44 = vld [vmem:[%s286_s4] ss:$0 sm:$0xff] }
   0x6   :  { %196 = vmatprep.subr.mxu0 %v84_v16 }
   0x7   :  { %29 = vadd.xlane.f32.xlu0 %v28_v3  ;;  %197 = vmatpush3.msra.mxu0 %v84_v16 }
   0x8   :  { %198 = vmatprep.subr.mxu0 %v83_v17 }
   0x9   :  { %199 = vmatpush3.msra.mxu0 %v83_v17 }
  0x8c   :  { %v27_v4 = vpop.xlane.xlu0 %26 }
  0x8d   :  { %v32_v5 = vmul.f32 0.03125, %v27_v4 }
  0x8f   :  { %v34_v6 = vsub.f32 %v20_v0, %v32_v5 }
  0x90   :  { %v30_v7 = vpop.xlane.xlu0 %29 }
  0x91   :  { %v33_v8 = vmul.f32 0.03125, %v30_v7  ;;  %v36_v9 = vmul.f32 %v34_v6, %v34_v6  ;;  %v67_v35 = vmul.f32 %v181_v34, %v34_v6 }
  0x93   :  { %v35_v10 = vsub.f32 %v21_v1, %v33_v8  ;;  %v38_v11 = vsel %vm24_vm0, %v36_v9, 0.0 }
  0x94   :  { %39 = vadd.xlane.f32.xlu1 %v38_v11 }
  0x95   :  { %v37_v12 = vmul.f32 %v35_v10, %v35_v10  ;;  %v68_v39 = vmul.f32 %v181_v34, %v35_v10 }
  0x97   :  { %v41_v13 = vsel %vm24_vm0, %v37_v12, 0.0 }
  0x98   :  { %42 = vadd.xlane.f32.xlu1 %v41_v13 }
 0x11d   :  { %v40_v18 = vpop.xlane.xlu1 %39 }
 0x11e   :  { %v45_v19 = vmul.f32 0.032258064, %v40_v18 }
 0x120   :  { %203 = vrsqrt.f32 %v45_v19  ;;  %vm49_vm1 = vcmp.eq.f32.partialorder %v45_v19, inf  ;;  %v52_v24 = vand.u32 2147483648, %v45_v19  ;;  %vm51_vm2 = vcmp.eq.f32.partialorder %v45_v19, 0.0 }
 0x121   :  { %v43_v20 = vpop.xlane.xlu1 %42 }
 0x122   :  { %v46_v21 = vmul.f32 0.032258064, %v43_v20 }
 0x124   :  { %205 = vrsqrt.f32 %v46_v21  ;;  %vm56_vm3 = vcmp.eq.f32.partialorder %v46_v21, inf  ;;  %v59_v30 = vand.u32 2147483648, %v46_v21  ;;  %vm58_vm4 = vcmp.eq.f32.partialorder %v46_v21, 0.0 }
 0x12d   :  { %v204_v22 = vpop.eup %203 }
 0x12e   :  { %v48_v23 = vmul.f32 %v204_v22, %v45_v19 }
 0x130   :  { %v50_v25 = vsel %vm49_vm1, %v45_v19, %v48_v23 }
 0x131   :  { %v206_v26 = vpop.eup %205  ;;  %v53_v27 = vsel %vm51_vm2, %v52_v24, %v50_v25 }
 0x132   :  { %v55_v28 = vmul.f32 %v206_v26, %v46_v21  ;;  %v69_v29 = vadd.f32 1e-06, %v53_v27 }
 0x134   :  { %v57_v31 = vsel %vm56_vm3, %v46_v21, %v55_v28  ;;  %207 = vrcp.f32 %v69_v29 }
 0x135   :  { %v60_v32 = vsel %vm58_vm4, %v59_v30, %v57_v31 }
 0x136   :  { %v70_v33 = vadd.f32 1e-06, %v60_v32 }
 0x138   :  { %209 = vrcp.f32 %v70_v33 }
 0x141   :  { %v208_v36 = vpop.eup %207 }
 0x142   :  { %v72_v38 = vmul.f32 %v208_v36, %v67_v35 }
 0x144   :  { %v81_v40 = vadd.f32 %v182_v37, %v72_v38 }
 0x145   :  { %v210_v41 = vpop.eup %209 }
 0x146   :  { %v74_v42 = vmul.f32 %v210_v41, %v68_v39  ;;  %200 = vmatprep.mubr.msk.f32.mxu0 %vm24_vm0, %v81_v40 }
 0x148   :  { %v82_v43 = vadd.f32 %v182_v37, %v74_v42 }
 0x14a   :  { %201 = vmatmul.mubr.msk.f32.vlgmr.msra.gmra.mxu0 %vm24_vm0, %v82_v43 }
 0x20a   :  { %v202_v45 = vpop.f32.mrf.mxu0 }
 0x20b   :  { %v172_v46 = vadd.f32 %v202_v45, %v183_v44 }
 0x20c   :  { %v166_v47 = vpop.f32.mrf.mxu0 }
 0x20d   :  { %176 = vst.msk [vmem:[%s287_s5 + $0x8] sm:$0xff] %vm24_vm0, %v172_v46  ;;  %v167_v48 = vadd.f32 %v183_v44, %v166_v47 }
 0x20f   :  { %175 = vst.msk [vmem:[%s287_s5] sm:$0xff] %vm24_vm0, %v167_v48 }

// kernel: decoder_forward.18
= control target key start
LH: loop header
LB: loop body
LE: loop exit
PB: predicated region body
PF: predicated region fallthrough
CT: control target
= control target key end

     0   :  { %s1134_s15 = smov 0   ;;  %s1214_s0 = inlined_call_operand.vmem [shape: f32[2,4,8,8], index: 0, kind: input, shape index: {}]   ;;  %s1215_s1 = inlined_call_operand.vmem [shape: f32[2,4,8,8], index: 1, kind: input, shape index: {}]   ;;  %s1216_s2 = inlined_call_operand.vmem [shape: f32[2,4,8,8], index: 2, kind: input, shape index: {}]   ;;  %s1217_s3 = inlined_call_operand.vmem [shape: s32[1,8,8], index: 3, kind: input, shape index: {}]   ;;  %s1218_s4 = inlined_call_operand.vmem [shape: f32[2,4,8,8], index: 4, kind: output, shape index: {}]  }
   0x1 LB: > { %s986_s16 = sadd.s32 4294967295, %s1105_s15   ;;  %p990_p0 = scmp.ge.s32.totalorder %s1105_s15, 1  ;;  %s1105_s15 = sphi %s1134_s15, %s14_s15  }
   0x2   : > { %p182_p1 = scmp.lt.s32.totalorder %s1105_s15, 3 }
   0x4   : > { %p183_p2 = pnand %p990_p0, %p182_p1 }
   0x5   : > { %p218_p3 = scmp.lt.s32.totalorder (!%p183_p2), %s986_s16, 1 }
   0x6   : > { %186 = sbr.rel (%p183_p2) target bundleno = 727 (0x2d7), region = 36 }
   0xb   : > { %v1107_v0 = vmov 0.0   ;;  %vm1108_vm0 = vmmov 0   ;;  %s1220_s16 = smov (!%p218_p3, %s986_s16), 1  ;;  %vm255_vm1 = vcmask 64512   ;;  %v254_v13 = vld [vmem:[%s1217_s3] sm:$0xff] }
   0xc   : > { %1033 = vmatprep.subr.mxu0 %v1107_v0  ;;  %1035 = vmatprep.mubr.msk.f32.mxu0 %vm1108_vm0, %v1107_v0  ;;  %s1148_s17 = sshll.u32 %s1220_s16, 5  ;;  %vm560_vm2 = vcmp.eq.s32.totalorder %v254_v13, 0 }
   0xd   : > { %1038 = vmatprep.subr.mxu1 %v1107_v0  ;;  %1040 = vmatprep.mubr.msk.f32.mxu1 %vm1108_vm0, %v1107_v0  ;;  %s227_s20 = scalar_lea.vmem %s1215_s1, %s1148_s17  ;;  %s222_s23 = scalar_lea.vmem %s1214_s0, %s1148_s17 }
   0xe   : > { %v246_v1 = vld [vmem:[%s227_s20] sm:$0xff]  ;;  %v247_v3 = vld [vmem:[%s227_s20 + $0x8] sm:$0xff]  ;;  %v240_v6 = vld [vmem:[%s222_s23 + $0x10] sm:$0xff]  ;;  %s232_s28 = scalar_lea.vmem %s1216_s2, %s1148_s17  ;;  %s237_s5 = scalar_lea.vmem %s1218_s4, %s1148_s17 }
   0xf   : > { %v238_v2 = vld [vmem:[%s222_s23] sm:$0xff]  ;;  %1034 = vmatpush3.xpose.msk.msra.mxu0 %vm255_vm1, %v246_v1  ;;  %1039 = vmatpush3.xpose.msk.msra.mxu1 %vm255_vm1, %v247_v3  ;;  %v239_v5 = vld [vmem:[%s222_s23 + $0x8] sm:$0xff]  ;;  %v248_v7 = vld [vmem:[%s227_s20 + $0x10] sm:$0xff]  ;;  %v244_v11 = vmul.f32 0.35355338, %v240_v6 }
  0x10   : > { %v242_v4 = vmul.f32 0.35355338, %v238_v2  ;;  %1043 = vmatprep.subr.mxu0 %v1107_v0  ;;  %v243_v8 = vmul.f32 0.35355338, %v239_v5  ;;  %1048 = vmatprep.subr.mxu1 %v1107_v0  ;;  %v241_v9 = vld [vmem:[%s222_s23 + $0x18] sm:$0xff]  ;;  %v250_v50 = vld [vmem:[%s232_s28] sm:$0xff] }
  0x11   : > { %v249_v10 = vld [vmem:[%s227_s20 + $0x18] sm:$0xff]  ;;  %v245_v12 = vmul.f32 0.35355338, %v241_v9  ;;  %v251_v51 = vld [vmem:[%s232_s28 + $0x8] sm:$0xff]  ;;  %v252_v58 = vld [vmem:[%s232_s28 + $0x10] sm:$0xff] }
  0x12   : > { %1036 = vmatmul.mubr.msk.f32.vlgmr.msra.gmra.mxu0 %vm255_vm1, %v242_v4  ;;  %1041 = vmatmul.mubr.msk.f32.vlgmr.msra.gmra.mxu1 %vm255_vm1, %v243_v8  ;;  %v253_v62 = vld [vmem:[%s232_s28 + $0x18] sm:$0xff] }
  0x13   : > { %1044 = vmatpush3.xpose.msk.msra.mxu0 %vm255_vm1, %v248_v7  ;;  %1045 = vmatprep.mubr.msk.f32.mxu0 %vm1108_vm0, %v1107_v0 }
  0x14   : > { %1049 = vmatpush3.xpose.msk.msra.mxu1 %vm255_vm1, %v249_v10  ;;  %1050 = vmatprep.mubr.msk.f32.mxu1 %vm1108_vm0, %v1107_v0 }
  0x15   : > { %1053 = vmatprep.subr.mxu0 %v1107_v0  ;;  %1058 = vmatprep.subr.mxu1 %v1107_v0 }
  0x16   : > { %1046 = vmatmul.mubr.msk.f32.vlgmr.msra.gmra.mxu0 %vm255_vm1, %v244_v11 }
  0x17   : > { %1051 = vmatmul.mubr.msk.f32.vlgmr.msra.gmra.mxu1 %vm255_vm1, %v245_v12  ;;  %1055 = vmatprep.mubr.msk.f32.mxu0 %vm1108_vm0, %v1107_v0 }
  0x18   : > { %1060 = vmatprep.mubr.msk.f32.mxu1 %vm1108_vm0, %v1107_v0  ;;  %1054 = vmatpush3.msra.mxu0 %v250_v50 }
  0x19   : > { %1063 = vmatprep.subr.mxu0 %v1107_v0  ;;  %1059 = vmatpush3.msra.mxu1 %v251_v51 }
  0x1a   : > { %1068 = vmatprep.subr.mxu1 %v1107_v0 }
  0xd2   : > { %v328_v14 = vpop.f32.mrf.mxu0  ;;  %v404_v15 = vpop.f32.mrf.mxu1 }
  0xd3   : > { %v563_v16 = vsel %vm560_vm2, -1e+09, %v328_v14  ;;  %v564_v17 = vsel %vm560_vm2, -1e+09, %v404_v15 }
  0xd4   : > { %v1037_v18 = vpop.f32.mrf.mxu0  ;;  %v567_v19 = vsel %vm255_vm1, %v563_v16, -inf  ;;  %v1042_v20 = vpop.f32.mrf.mxu1  ;;  %v570_v22 = vsel %vm255_vm1, %v564_v17, -inf }
  0xd5   : > { %568 = vmax.xlane.f32.xlu0 %v567_v19 }
  0xd6   : > { %v480_v21 = vpop.f32.mrf.mxu0 }
  0xd7   : > { %v565_v23 = vsel %vm560_vm2, -1e+09, %v480_v21  ;;  %v556_v24 = vpop.f32.mrf.mxu1 }
  0xd8   : > { %v1047_v25 = vpop.f32.mrf.mxu0  ;;  %v566_v26 = vsel %vm560_vm2, -1e+09, %v556_v24  ;;  %v573_v27 = vsel %vm255_vm1, %v565_v23, -inf }
  0xd9   : > { %571 = vmax.xlane.f32.xlu0 %v570_v22  ;;  %574 = vmax.xlane.f32.xlu1 %v573_v27  ;;  %v1052_v28 = vpop.f32.mrf.mxu1  ;;  %v576_v29 = vsel %vm255_vm1, %v566_v26, -inf }
  0xdd   : > { %577 = vmax.xlane.f32.xlu1 %v576_v29 }
 0x15e   : > { %v569_v30 = vpop.xlane.xlu0 %568 }
 0x15f   : > { %v579_v31 = vsub.f32 %v563_v16, %v569_v30 }
 0x161   : > { %v583_v32 = vmul.f32 1.442695, %v579_v31 }
 0x162   : > { %v572_v33 = vpop.xlane.xlu0 %571  ;;  %v575_v34 = vpop.xlane.xlu1 %574 }
 0x163   : > { %1083 = vpow2.f32 %v583_v32  ;;  %v580_v35 = vsub.f32 %v564_v17, %v572_v33  ;;  %v581_v36 = vsub.f32 %v565_v23, %v575_v34 }
 0x165   : > { %v585_v37 = vmul.f32 1.442695, %v580_v35  ;;  %v587_v38 = vmul.f32 1.442695, %v581_v36 }
 0x166   : > { %v578_v39 = vpop.xlane.xlu1 %577 }
 0x167   : > { %1085 = vpow2.f32 %v585_v37  ;;  %v582_v40 = vsub.f32 %v566_v26, %v578_v39 }
 0x168   : > { %1087 = vpow2.f32 %v587_v38 }
 0x169   : > { %v589_v41 = vmul.f32 1.442695, %v582_v40 }
 0x16b   : > { %1089 = vpow2.f32 %v589_v41 }
 0x170   : > { %v1084_v42 = vpop.eup %1083 }
 0x171   : > { %v591_v43 = vsel %vm255_vm1, %v1084_v42, 0.0 }
 0x172   : > { %592 = vadd.xlane.f32.xlu0 %v591_v43 }
 0x174   : > { %v1086_v44 = vpop.eup %1085 }
 0x175   : > { %v1088_v45 = vpop.eup %1087  ;;  %v594_v46 = vsel %vm255_vm1, %v1086_v44, 0.0 }
 0x176   : > { %595 = vadd.xlane.f32.xlu1 %v594_v46  ;;  %v597_v47 = vsel %vm255_vm1, %v1088_v45, 0.0 }
 0x177   : > { %598 = vadd.xlane.f32.xlu0 %v597_v47 }
 0x178   : > { %v1090_v48 = vpop.eup %1089 }
 0x179   : > { %v600_v49 = vsel %vm255_vm1, %v1090_v48, 0.0 }
 0x17a   : > { %601 = vadd.xlane.f32.xlu1 %v600_v49 }
 0x1fb   : > { %v593_v52 = vpop.xlane.xlu0 %592 }
 0x1fc   : > { %1091 = vrcp.f32 %v593_v52 }
 0x1ff   : > { %v596_v53 = vpop.xlane.xlu1 %595 }
 0x200   : > { %v599_v54 = vpop.xlane.xlu0 %598  ;;  %1093 = vrcp.f32 %v596_v53 }
 0x201   : > { %1095 = vrcp.f32 %v599_v54 }
 0x203   : > { %v602_v55 = vpop.xlane.xlu1 %601 }
 0x204   : > { %1097 = vrcp.f32 %v602_v55 }
 0x209   : > { %v1092_v56 = vpop.eup %1091 }
 0x20a   : > { %v607_v57 = vmul.f32 %v1092_v56, %v1084_v42 }
 0x20c   : > { %1056 = vmatmul.mubr.msk.f32.vlgmr.msra.gmra.mxu0 %vm255_vm1, %v607_v57 }
 0x20d   : > { %v1094_v59 = vpop.eup %1093  ;;  %1064 = vmatpush3.msra.mxu0 %v252_v58  ;;  %1065 = vmatprep.mubr.msk.f32.mxu0 %vm1108_vm0, %v1107_v0 }
 0x20e   : > { %v1096_v60 = vpop.eup %1095  ;;  %v608_v61 = vmul.f32 %v1094_v59, %v1086_v44 }
 0x20f   : > { %v609_v63 = vmul.f32 %v1096_v60, %v1088_v45 }
 0x210   : > { %1061 = vmatmul.mubr.msk.f32.vlgmr.msra.gmra.mxu1 %vm255_vm1, %v608_v61 }
 0x211   : > { %v1098_v1 = vpop.eup %1097  ;;  %1066 = vmatmul.mubr.msk.f32.vlgmr.msra.gmra.mxu0 %vm255_vm1, %v609_v63  ;;  %1069 = vmatpush3.msra.mxu1 %v253_v62 }
 0x212   : > { %1070 = vmatprep.mubr.msk.f32.mxu1 %vm1108_vm0, %v1107_v0  ;;  %v610_v2 = vmul.f32 %v1098_v1, %v1090_v48 }
 0x214   : > { %1071 = vmatmul.mubr.msk.f32.vlgmr.msra.gmra.mxu1 %vm255_vm1, %v610_v2 }
 0x2cc   : > { %v680_v3 = vpop.f32.mrf.mxu0 }
 0x2cd   : > { %903 = vst.msk [vmem:[%s237_s5] sm:$0xff] %vm255_vm1, %v680_v3 }
 0x2ce   : > { %v1057_v4 = vpop.f32.mrf.mxu0 }
 0x2d0   : > { %v753_v5 = vpop.f32.mrf.mxu1 }
 0x2d1   : > { %904 = vst.msk [vmem:[%s237_s5 + $0x8] sm:$0xff] %vm255_vm1, %v753_v5  ;;  %v826_v6 = vpop.f32.mrf.mxu0 }
 0x2d2   : > { %905 = vst.msk [vmem:[%s237_s5 + $0x10] sm:$0xff] %vm255_vm1, %v826_v6  ;;  %v1062_v7 = vpop.f32.mrf.mxu1 }
 0x2d3   : > { %v1067_v8 = vpop.f32.mrf.mxu0 }
 0x2d4   : > { %v899_v0 = vpop.f32.mrf.mxu1 }
 0x2d5   : > { %906 = vst.msk [vmem:[%s237_s5 + $0x18] sm:$0xff] %vm255_vm1, %v899_v0 }
 0x2d6   : > { %v1072_v9 = vpop.f32.mrf.mxu1 }
 0x2d7 PF: > { %s14_s15 = sadd.s32 1, %s1105_s15  }
 0x2d8   : > { %p11_p4 = scmp.ge.s32.totalorder %s14_s15, 4  }
 0x2da   :  { %13 = sbr.rel (!%p11_p4) target bundleno = 1 (0x1), region = 72 }

// kernel: decoder_forward.21
= control target key start
LH: loop header
LB: loop body
LE: loop exit
PB: predicated region body
PF: predicated region fallthrough
CT: control target
= control target key end

     0   :  { %vm29_vm0 = vcmask 261120   ;;  %vm18_vm1 = vcmask 523264   ;;  %v157_v2 = vmov 0.0   ;;  %s213_s1 = inlined_call_operand.vmem [shape: f32[32,64], index: 1, kind: input, shape index: {}]   ;;  %s214_s0 = inlined_call_operand.vmem [shape: f32[16,32], index: 0, kind: input, shape index: {}]   ;;  %s215_s2 = inlined_call_operand.vmem [shape: f32[1,64], index: 2, kind: input, shape index: {}]   ;;  %s216_s3 = inlined_call_operand.vmem [shape: f32[16,64], index: 3, kind: output, shape index: {}]  }
   0x1   :  { %v28_v0 = vld [vmem:[%s213_s1 + $0x18] sm:$0xff]  ;;  %v27_v1 = vld [vmem:[%s213_s1 + $0x10] sm:$0xff]  ;;  %20 = vst.msk [vmem:[#allocation2 + $0x8] sm:$0xff] %vm18_vm1, %v157_v2  ;;  %19 = vst.msk [vmem:[#allocation2] sm:$0xff] %vm18_vm1, %v157_v2 }
   0x2   :  { %145 = vmatprep.subr.mxu0 %v28_v0  ;;  %v23_v3 = vld [vmem:[%s214_s0] sm:$0xff]  ;;  %v26_v4 = vld [vmem:[%s213_s1 + $0x8] sm:$0xff] }
   0x3   :  { %146 = vmatpush3.msra.mxu0 %v28_v0  ;;  %153 = vmatprep.mubr.msk.f32.mxu0 %vm29_vm0, %v23_v3  ;;  %v25_v5 = vld [vmem:[%s213_s1] sm:$0xff]  ;;  %v24_v6 = vld [vmem:[%s214_s0 + $0x8] sm:$0xff] }
   0x4   :  { %147 = vmatprep.subr.mxu0 %v27_v1  ;;  %v138_v13 = vld [vmem:[%s215_s2] ss:$0 sm:$0xff] }
   0x5   :  { %148 = vmatpush3.msra.mxu0 %v27_v1 }
   0x6   :  { %149 = vmatprep.subr.mxu0 %v26_v4 }
   0x7   :  { %150 = vmatpush3.msra.mxu0 %v26_v4 }
   0x8   :  { %151 = vmatprep.subr.mxu0 %v25_v5  ;;  %v22_v7 = vld [vmem:[#allocation2 + $0x8] sm:$0xff]  ;;  %v21_v9 = vld [vmem:[#allocation2] sm:$0xff] }
   0x9   :  { %152 = vmatpush3.msra.mxu0 %v25_v5 }
   0xa   :  { %154 = vmatmul.mubr.msk.f32.vlgmr.msra.gmra.mxu0 %vm29_vm0, %v24_v6 }
  0xca   :  { %v155_v8 = vpop.f32.mrf.mxu0 }
  0xcb   :  { %v112_v10 = vadd.f32 %v155_v8, %v22_v7 }
  0xcc   :  { %v102_v11 = vpop.f32.mrf.mxu0 }
  0xcd   :  { %115 = vst.msk [vmem:[#allocation2 + $0x8] sm:$0xff] %vm18_vm1, %v112_v10  ;;  %v111_v12 = vadd.f32 %v102_v11, %v21_v9 }
  0xcf   :  { %114 = vst.msk [vmem:[#allocation2] sm:$0xff] %vm18_vm1, %v111_v12 }
  0xd4   :  { %v120_v14 = vld [vmem:[#allocation2 + $0x8] sm:$0xff] }
  0xd5   :  { %v129_v15 = vadd.f32 %v138_v13, %v120_v14 }
  0xd6   :  { %v119_v16 = vld [vmem:[#allocation2] sm:$0xff] }
  0xd7   :  { %131 = vst.msk [vmem:[%s216_s3 + $0x8] sm:$0xff] %vm18_vm1, %v129_v15  ;;  %v128_v17 = vadd.f32 %v138_v13, %v119_v16 }
  0xd9   :  { %130 = vst.msk [vmem:[%s216_s3] sm:$0xff] %vm18_vm1, %v128_v17 }

// kernel: decoder_forward.33
= control target key start
LH: loop header
LB: loop body
LE: loop exit
PB: predicated region body
PF: predicated region fallthrough
CT: control target
= control target key end

     0   :  { %vm19_vm0 = vcmask 261120   ;;  %s175_s0 = inlined_call_operand.vmem [shape: f32[16,32], index: 0, kind: input, shape index: {}]   ;;  %s176_s1 = inlined_call_operand.vmem [shape: f32[1,32], index: 1, kind: input, shape index: {}]   ;;  %s177_s2 = inlined_call_operand.vmem [shape: f32[1,32], index: 2, kind: input, shape index: {}]   ;;  %s178_s3 = inlined_call_operand.hbm [shape: f32[16,32], index: 3, kind: output, shape index: {}]  }
   0x1   :  { %v15_v0 = vld [vmem:[%s175_s0] sm:$0xff]  ;;  %v16_v1 = vld [vmem:[%s175_s0 + $0x8] sm:$0xff] }
   0x2   :  { %v20_v2 = vsel %vm19_vm0, %v15_v0, 0.0 }
   0x3   :  { %8 = vsyncpa [#allocation3], 0  ;;  %21 = vadd.xlane.f32.xlu0 %v20_v2  ;;  %v23_v3 = vsel %vm19_vm0, %v16_v1, 0.0  ;;  %v96_v30 = vld [vmem:[%s176_s1] ss:$0 sm:$0xff]  ;;  %s131_s19 = smov [#allocation2]  }
   0x4   :  { %v97_v33 = vld [vmem:[%s177_s2] ss:$0 sm:$0xff]  ;;  %s85_s20 = sshll.u32 %s131_s19, 4  ;;  %s86_s20 = int_to_ptr.vmem [resolvable:$true] %s85_s20 }
   0x5   :  { %s109_s1 = scalar_lea.vmem %s86_s20, 256  ;;  %p114_p1 = scmp.lt.s32.totalorder %s86_s20, %s86_s20 }
   0x6   :  { %p110_p0 = scmp.ne.s32.totalorder %s86_s20, %s109_s1  ;;  %p115_p2 = scmp.lt.s32.totalorder %s109_s1, %s109_s1 }
   0x7   :  { %24 = vadd.xlane.f32.xlu0 %v23_v3 }
   0x8   :  { %p116_p3 = por %p115_p2, %p114_p1 }
   0xa   :  { %p117_p4 = pnand %p116_p3, %p110_p0 }
  0x8c   :  { %v22_v4 = vpop.xlane.xlu0 %21 }
  0x8d   :  { %v27_v5 = vmul.f32 0.03125, %v22_v4 }
  0x8f   :  { %v29_v6 = vsub.f32 %v15_v0, %v27_v5 }
  0x90   :  { %v25_v7 = vpop.xlane.xlu0 %24 }
  0x91   :  { %v28_v8 = vmul.f32 0.03125, %v25_v7  ;;  %v31_v9 = vmul.f32 %v29_v6, %v29_v6  ;;  %v62_v31 = vmul.f32 %v96_v30, %v29_v6 }
  0x93   :  { %v30_v10 = vsub.f32 %v16_v1, %v28_v8  ;;  %v33_v11 = vsel %vm19_vm0, %v31_v9, 0.0 }
  0x94   :  { %34 = vadd.xlane.f32.xlu1 %v33_v11 }
  0x95   :  { %v32_v12 = vmul.f32 %v30_v10, %v30_v10  ;;  %v63_v35 = vmul.f32 %v96_v30, %v30_v10 }
  0x97   :  { %v36_v13 = vsel %vm19_vm0, %v32_v12, 0.0 }
  0x98   :  { %37 = vadd.xlane.f32.xlu1 %v36_v13 }
 0x11d   :  { %v35_v14 = vpop.xlane.xlu1 %34 }
 0x11e   :  { %v40_v15 = vmul.f32 0.032258064, %v35_v14 }
 0x120   :  { %101 = vrsqrt.f32 %v40_v15  ;;  %vm44_vm1 = vcmp.eq.f32.partialorder %v40_v15, inf  ;;  %v47_v20 = vand.u32 2147483648, %v40_v15  ;;  %vm46_vm2 = vcmp.eq.f32.partialorder %v40_v15, 0.0 }
 0x121   :  { %v38_v16 = vpop.xlane.xlu1 %37 }
 0x122   :  { %v41_v17 = vmul.f32 0.032258064, %v38_v16 }
 0x124   :  { %103 = vrsqrt.f32 %v41_v17  ;;  %vm51_vm3 = vcmp.eq.f32.partialorder %v41_v17, inf  ;;  %v54_v26 = vand.u32 2147483648, %v41_v17  ;;  %vm53_vm4 = vcmp.eq.f32.partialorder %v41_v17, 0.0 }
 0x12d   :  { %v102_v18 = vpop.eup %101 }
 0x12e   :  { %v43_v19 = vmul.f32 %v102_v18, %v40_v15 }
 0x130   :  { %v45_v21 = vsel %vm44_vm1, %v40_v15, %v43_v19 }
 0x131   :  { %v104_v22 = vpop.eup %103  ;;  %v48_v23 = vsel %vm46_vm2, %v47_v20, %v45_v21 }
 0x132   :  { %v64_v24 = vadd.f32 1e-06, %v48_v23  ;;  %v50_v25 = vmul.f32 %v104_v22, %v41_v17 }
 0x134   :  { %105 = vrcp.f32 %v64_v24  ;;  %v52_v27 = vsel %vm51_vm3, %v41_v17, %v50_v25 }
 0x135   :  { %v55_v28 = vsel %vm53_vm4, %v54_v26, %v52_v27 }
 0x136   :  { %v65_v29 = vadd.f32 1e-06, %v55_v28 }
 0x138   :  { %107 = vrcp.f32 %v65_v29 }
 0x141   :  { %v106_v32 = vpop.eup %105 }
 0x142   :  { %v67_v34 = vmul.f32 %v106_v32, %v62_v31 }
 0x144   :  { %v76_v36 = vadd.f32 %v97_v33, %v67_v34 }
 0x145   :  { %v108_v37 = vpop.eup %107 }
 0x146   :  { %v69_v38 = vmul.f32 %v108_v37, %v63_v35  ;;  %78 = vst.msk [vmem:[#allocation2] sm:$0xff] %vm19_vm0, %v76_v36 }
 0x148   :  { %v77_v39 = vadd.f32 %v97_v33, %v69_v38 }
 0x14a   :  { %79 = vst.msk [vmem:[#allocation2 + $0x8] sm:$0xff] %vm19_vm0, %v77_v39 }
 0x14b   :  { %120 = shalt.err (!%p117_p4)
}
 0x14c   :  { %s132_s2 = smov 128   ;;  %s133_s21 = smov 8  }
 0x14d   :  { %91 = dma.vmem_to_hbm [thread:$0]  %s86_s20, 256, %s178_s3, [#allocation3], %s132_s2, %s132_s2, %s133_s21  }
 0x14e   :  { %129 = dma.done.wait [#allocation3], 256  }
 0x14f   :  { %130 = vsyncadd [#allocation3], 4294967040 }
 0x150   :  { %95 = vsyncpa [#allocation3], 1 }

// kernel: decoder_forward.24
= control target key start
LH: loop header
LB: loop body
LE: loop exit
PB: predicated region body
PF: predicated region fallthrough
CT: control target
= control target key end

     0   :  { %vm34_vm0 = vcmask 261120   ;;  %v377_v54 = vmov 0.0   ;;  %vm204_vm5 = vcmask 523264   ;;  %s512_s0 = inlined_call_operand.vmem [shape: f32[16,32], index: 0, kind: input, shape index: {}]   ;;  %s513_s3 = inlined_call_operand.vmem [shape: f32[32,64], index: 3, kind: input, shape index: {}]   ;;  %s514_s5 = inlined_call_operand.vmem [shape: f32[64,32], index: 5, kind: input, shape index: {}]   ;;  %s515_s1 = inlined_call_operand.vmem [shape: f32[1,32], index: 1, kind: input, shape index: {}]   ;;  %s516_s2 = inlined_call_operand.vmem [shape: f32[1,32], index: 2, kind: input, shape index: {}]   ;;  %s517_s4 = inlined_call_operand.vmem [shape: f32[1,64], index: 4, kind: input, shape index: {}]   ;;  %s518_s6 = inlined_call_operand.vmem [shape: f32[1,32], index: 6, kind: input, shape index: {}]   ;;  %s519_s7 = inlined_call_operand.vmem [shape: f32[16,32], index: 7, kind: output, shape index: {}]  }
   0x1   :  { %v421_v0 = vld [vmem:[%s512_s0] sm:$0xff]  ;;  %v426_v1 = vld [vmem:[%s512_s0 + $0x8] sm:$0xff]  ;;  %v102_v14 = vld [vmem:[%s513_s3 + $0x18] sm:$0xff]  ;;  %96 = vst.msk [vmem:[#allocation3 + $0x8] sm:$0xff] %vm34_vm0, %v377_v54 }
   0x2   :  { %v35_v2 = vsel %vm34_vm0, %v421_v0, 0.0  ;;  %v38_v3 = vsel %vm34_vm0, %v426_v1, 0.0  ;;  %v101_v15 = vld [vmem:[%s513_s3 + $0x10] sm:$0xff]  ;;  %338 = vmatprep.subr.mxu0 %v102_v14  ;;  %v100_v16 = vld [vmem:[%s513_s3 + $0x8] sm:$0xff]  ;;  %v99_v17 = vld [vmem:[%s513_s3] sm:$0xff]  ;;  %95 = vst.msk [vmem:[#allocation3] sm:$0xff] %vm34_vm0, %v377_v54 }
   0x3   :  { %36 = vadd.xlane.f32.xlu0 %v35_v2  ;;  %339 = vmatpush3.msra.mxu0 %v102_v14  ;;  %v203_v18 = vld [vmem:[%s514_s5 + $0x38] sm:$0xff]  ;;  %v202_v19 = vld [vmem:[%s514_s5 + $0x30] sm:$0xff]  ;;  %v201_v20 = vld [vmem:[%s514_s5 + $0x28] sm:$0xff] }
   0x4   :  { %340 = vmatprep.subr.mxu0 %v101_v15  ;;  %349 = vmatprep.subr.mxu1 %v203_v18  ;;  %v200_v21 = vld [vmem:[%s514_s5 + $0x20] sm:$0xff]  ;;  %v199_v50 = vld [vmem:[%s514_s5 + $0x18] sm:$0xff]  ;;  %v198_v51 = vld [vmem:[%s514_s5 + $0x10] sm:$0xff] }
   0x5   :  { %341 = vmatpush3.msra.mxu0 %v101_v15  ;;  %350 = vmatpush3.msra.mxu1 %v203_v18  ;;  %v314_v38 = vld [vmem:[%s515_s1] ss:$0 sm:$0xff]  ;;  %v197_v52 = vld [vmem:[%s514_s5 + $0x8] sm:$0xff] }
   0x6   :  { %342 = vmatprep.subr.mxu0 %v100_v16  ;;  %351 = vmatprep.subr.mxu1 %v202_v19  ;;  %v315_v41 = vld [vmem:[%s516_s2] ss:$0 sm:$0xff] }
   0x7   :  { %39 = vadd.xlane.f32.xlu0 %v38_v3  ;;  %343 = vmatpush3.msra.mxu0 %v100_v16  ;;  %v196_v53 = vld [vmem:[%s514_s5] sm:$0xff] }
   0x8   :  { %344 = vmatprep.subr.mxu0 %v99_v17  ;;  %352 = vmatpush3.msra.mxu1 %v202_v19  ;;  %v316_v55 = vld [vmem:[%s517_s4] ss:$0 sm:$0xff]  ;;  %v195_v62 = vld [vmem:[#allocation3 + $0x8] sm:$0xff] }
   0x9   :  { %345 = vmatpush3.msra.mxu0 %v99_v17  ;;  %353 = vmatprep.subr.mxu1 %v201_v20  ;;  %v194_v2 = vld [vmem:[#allocation3] sm:$0xff] }
   0xa   :  { %354 = vmatpush3.msra.mxu1 %v201_v20 }
   0xb   :  { %355 = vmatprep.subr.mxu1 %v200_v21 }
   0xc   :  { %356 = vmatpush3.msra.mxu1 %v200_v21 }
   0xd   :  { %357 = vmatprep.subr.mxu1 %v199_v50 }
   0xe   :  { %358 = vmatpush3.msra.mxu1 %v199_v50 }
   0xf   :  { %359 = vmatprep.subr.mxu1 %v198_v51 }
  0x10   :  { %360 = vmatpush3.msra.mxu1 %v198_v51 }
  0x11   :  { %361 = vmatprep.subr.mxu1 %v197_v52 }
  0x12   :  { %362 = vmatpush3.msra.mxu1 %v197_v52 }
  0x13   :  { %363 = vmatprep.subr.mxu1 %v196_v53 }
  0x14   :  { %364 = vmatpush3.msra.mxu1 %v196_v53 }
  0x8c   :  { %v37_v4 = vpop.xlane.xlu0 %36 }
  0x8d   :  { %v42_v5 = vmul.f32 0.03125, %v37_v4 }
  0x8f   :  { %v433_v6 = vsub.f32 %v421_v0, %v42_v5 }
  0x90   :  { %v40_v7 = vpop.xlane.xlu0 %39 }
  0x91   :  { %v43_v8 = vmul.f32 0.03125, %v40_v7  ;;  %v46_v9 = vmul.f32 %v433_v6, %v433_v6  ;;  %v77_v39 = vmul.f32 %v314_v38, %v433_v6  ;;  %v321_v7 = vld [vmem:[%s518_s6] ss:$0 sm:$0xff] }
  0x93   :  { %v438_v10 = vsub.f32 %v426_v1, %v43_v8  ;;  %v48_v11 = vsel %vm34_vm0, %v46_v9, 0.0 }
  0x94   :  { %49 = vadd.xlane.f32.xlu1 %v48_v11 }
  0x95   :  { %v47_v12 = vmul.f32 %v438_v10, %v438_v10  ;;  %v78_v43 = vmul.f32 %v314_v38, %v438_v10 }
  0x97   :  { %v51_v13 = vsel %vm34_vm0, %v47_v12, 0.0 }
  0x98   :  { %52 = vadd.xlane.f32.xlu1 %v51_v13 }
 0x11d   :  { %v50_v22 = vpop.xlane.xlu1 %49 }
 0x11e   :  { %v55_v23 = vmul.f32 0.032258064, %v50_v22 }
 0x120   :  { %369 = vrsqrt.f32 %v55_v23  ;;  %vm59_vm1 = vcmp.eq.f32.partialorder %v55_v23, inf  ;;  %v62_v28 = vand.u32 2147483648, %v55_v23  ;;  %vm61_vm2 = vcmp.eq.f32.partialorder %v55_v23, 0.0 }
 0x121   :  { %v53_v24 = vpop.xlane.xlu1 %52 }
 0x122   :  { %v56_v25 = vmul.f32 0.032258064, %v53_v24 }
 0x124   :  { %371 = vrsqrt.f32 %v56_v25  ;;  %vm66_vm3 = vcmp.eq.f32.partialorder %v56_v25, inf  ;;  %v69_v34 = vand.u32 2147483648, %v56_v25  ;;  %vm68_vm4 = vcmp.eq.f32.partialorder %v56_v25, 0.0 }
 0x12d   :  { %v370_v26 = vpop.eup %369 }
 0x12e   :  { %v58_v27 = vmul.f32 %v370_v26, %v55_v23 }
 0x130   :  { %v60_v29 = vsel %vm59_vm1, %v55_v23, %v58_v27 }
 0x131   :  { %v372_v30 = vpop.eup %371  ;;  %v63_v31 = vsel %vm61_vm2, %v62_v28, %v60_v29 }
 0x132   :  { %v79_v32 = vadd.f32 1e-06, %v63_v31  ;;  %v65_v33 = vmul.f32 %v372_v30, %v56_v25 }
 0x134   :  { %373 = vrcp.f32 %v79_v32  ;;  %v67_v35 = vsel %vm66_vm3, %v56_v25, %v65_v33 }
 0x135   :  { %v70_v36 = vsel %vm68_vm4, %v69_v34, %v67_v35 }
 0x136   :  { %v80_v37 = vadd.f32 1e-06, %v70_v36 }
 0x138   :  { %375 = vrcp.f32 %v80_v37 }
 0x141   :  { %v374_v40 = vpop.eup %373 }
 0x142   :  { %v82_v42 = vmul.f32 %v374_v40, %v77_v39 }
 0x144   :  { %v91_v44 = vadd.f32 %v315_v41, %v82_v42 }
 0x145   :  { %v376_v45 = vpop.eup %375 }
 0x146   :  { %v84_v46 = vmul.f32 %v376_v45, %v78_v43  ;;  %93 = vst.msk [vmem:[#allocation2] sm:$0xff] %vm34_vm0, %v91_v44 }
 0x148   :  { %v92_v47 = vadd.f32 %v315_v41, %v84_v46 }
 0x14a   :  { %94 = vst.msk [vmem:[#allocation2 + $0x8] sm:$0xff] %vm34_vm0, %v92_v47 }
 0x14d   :  { %v97_v48 = vld [vmem:[#allocation2] sm:$0xff] }
 0x14e   :  { %346 = vmatprep.mubr.msk.f32.mxu0 %vm34_vm0, %v97_v48 }
 0x151   :  { %v98_v49 = vld [vmem:[#allocation2 + $0x8] sm:$0xff] }
 0x152   :  { %347 = vmatmul.mubr.msk.f32.vlgmr.msra.gmra.mxu0 %vm34_vm0, %v98_v49 }
 0x212   :  { %v348_v56 = vpop.f32.mrf.mxu0 }
 0x213   :  { %v189_v57 = vadd.f32 %v348_v56, %v316_v55 }
 0x214   :  { %v183_v58 = vpop.f32.mrf.mxu0 }
 0x215   :  { %v184_v59 = vadd.f32 %v316_v55, %v183_v58  ;;  %v193_v61 = vmax.f32 %v189_v57, 0.0 }
 0x217   :  { %v192_v60 = vmax.f32 %v184_v59, 0.0 }
 0x219   :  { %365 = vmatprep.mubr.msk.f32.mxu1 %vm204_vm5, %v192_v60 }
 0x21a   :  { %366 = vmatmul.mubr.msk.f32.vlgmr.msra.gmra.mxu1 %vm204_vm5, %v193_v61 }
 0x2da   :  { %v367_v63 = vpop.f32.mrf.mxu1 }
 0x2db   :  { %v287_v3 = vadd.f32 %v367_v63, %v195_v62 }
 0x2dc   :  { %v277_v4 = vpop.f32.mrf.mxu1 }
 0x2dd   :  { %289 = vst.msk [vmem:[#allocation3 + $0x8] sm:$0xff] %vm34_vm0, %v287_v3  ;;  %v286_v5 = vadd.f32 %v277_v4, %v194_v2 }
 0x2df   :  { %288 = vst.msk [vmem:[#allocation3] sm:$0xff] %vm34_vm0, %v286_v5 }
 0x2e4   :  { %v296_v6 = vld [vmem:[#allocation3 + $0x8] sm:$0xff] }
 0x2e5   :  { %v298_v8 = vadd.f32 %v296_v6, %v426_v1 }
 0x2e6   :  { %v295_v9 = vld [vmem:[#allocation3] sm:$0xff] }
 0x2e7   :  { %v307_v10 = vadd.f32 %v321_v7, %v298_v8  ;;  %v297_v11 = vadd.f32 %v295_v9, %v421_v0 }
 0x2e9   :  { %309 = vst.msk [vmem:[%s519_s7 + $0x8] sm:$0xff] %vm34_vm0, %v307_v10  ;;  %v306_v12 = vadd.f32 %v321_v7, %v297_v11 }
 0x2eb   :  { %308 = vst.msk [vmem:[%s519_s7] sm:$0xff] %vm34_vm0, %v306_v12 }

// kernel: decoder_forward.22
= control target key start
LH: loop header
LB: loop body
LE: loop exit
PB: predicated region body
PF: predicated region fallthrough
CT: control target
= control target key end

     0   :  { %s1140_s15 = smov 0   ;;  %s1220_s0 = inlined_call_operand.vmem [shape: f32[2,4,8,8], index: 0, kind: input, shape index: {}]   ;;  %s1221_s1 = inlined_call_operand.vmem [shape: f32[2,4,8,8], index: 1, kind: input, shape index: {}]   ;;  %s1222_s2 = inlined_call_operand.vmem [shape: f32[2,4,8,8], index: 2, kind: input, shape index: {}]   ;;  %s1223_s3 = inlined_call_operand.vmem [shape: s32[1,1,8], index: 3, kind: input, shape index: {}]   ;;  %s1224_s4 = inlined_call_operand.vmem [shape: f32[2,4,8,8], index: 4, kind: output, shape index: {}]  }
   0x1 LB: > { %s990_s16 = sadd.s32 4294967295, %s1110_s15   ;;  %p994_p0 = scmp.ge.s32.totalorder %s1110_s15, 1  ;;  %s1110_s15 = sphi %s1140_s15, %s14_s15  }
   0x2   : > { %p182_p1 = scmp.lt.s32.totalorder %s1110_s15, 3 }
   0x4   : > { %p183_p2 = pnand %p994_p0, %p182_p1 }
   0x5   : > { %p218_p3 = scmp.lt.s32.totalorder (!%p183_p2), %s990_s16, 1 }
   0x6   : > { %186 = sbr.rel (%p183_p2) target bundleno = 727 (0x2d7), region = 36 }
   0xb   : > { %v1112_v0 = vmov 0.0   ;;  %vm1113_vm0 = vmmov 0   ;;  %s1226_s16 = smov (!%p218_p3, %s990_s16), 1  ;;  %vm255_vm1 = vcmask 64512   ;;  %v562_v13 = vlaneseq  ;;  %v254_v14 = vld [vmem:[%s1223_s3] sm:$0x1] }
   0xc   : > { %1037 = vmatprep.subr.mxu0 %v1112_v0  ;;  %1039 = vmatprep.mubr.msk.f32.mxu0 %vm1113_vm0, %v1112_v0  ;;  %s1154_s17 = sshll.u32 %s1226_s16, 5  ;;  %vm560_vm2 = vcmp.eq.s32.totalorder %v254_v14, 0  ;;  %v1114_v17 = vmov 0  }
   0xd   : > { %1042 = vmatprep.subr.mxu1 %v1112_v0  ;;  %1044 = vmatprep.mubr.msk.f32.mxu1 %vm1113_vm0, %v1112_v0  ;;  %s227_s20 = scalar_lea.vmem %s1221_s1, %s1154_s17  ;;  %s222_s23 = scalar_lea.vmem %s1220_s0, %s1154_s17  ;;  %v563_v15 = vshrl.u32 %v562_v13, 7  ;;  %v561_v18 = vsel %vm560_vm2, 1, %v1114_v17 }
   0xe   : > { %v246_v1 = vld [vmem:[%s227_s20] sm:$0xff]  ;;  %v247_v3 = vld [vmem:[%s227_s20 + $0x8] sm:$0xff]  ;;  %v240_v6 = vld [vmem:[%s222_s23 + $0x10] sm:$0xff]  ;;  %s232_s28 = scalar_lea.vmem %s1222_s2, %s1154_s17  ;;  %s237_s5 = scalar_lea.vmem %s1224_s4, %s1154_s17 }
   0xf   : > { %v238_v2 = vld [vmem:[%s222_s23] sm:$0xff]  ;;  %1038 = vmatpush3.xpose.msk.msra.mxu0 %vm255_vm1, %v246_v1  ;;  %1043 = vmatpush3.xpose.msk.msra.mxu1 %vm255_vm1, %v247_v3  ;;  %v239_v5 = vld [vmem:[%s222_s23 + $0x8] sm:$0xff]  ;;  %v248_v7 = vld [vmem:[%s227_s20 + $0x10] sm:$0xff]  ;;  %v244_v11 = vmul.f32 0.35355338, %v240_v6  ;;  %v564_v16 = vsub.s32 0, %v563_v15 }
  0x10   : > { %v242_v4 = vmul.f32 0.35355338, %v238_v2  ;;  %1047 = vmatprep.subr.mxu0 %v1112_v0  ;;  %v243_v8 = vmul.f32 0.35355338, %v239_v5  ;;  %1052 = vmatprep.subr.mxu1 %v1112_v0  ;;  %v241_v9 = vld [vmem:[%s222_s23 + $0x18] sm:$0xff]  ;;  %v250_v56 = vld [vmem:[%s232_s28] sm:$0xff] }
  0x11   : > { %v249_v10 = vld [vmem:[%s227_s20 + $0x18] sm:$0xff]  ;;  %v245_v12 = vmul.f32 0.35355338, %v241_v9  ;;  %v565_v19 = vrot.slane %v561_v18, %v564_v16  ;;  %v251_v57 = vld [vmem:[%s232_s28 + $0x8] sm:$0xff]  ;;  %v252_v1 = vld [vmem:[%s232_s28 + $0x10] sm:$0xff] }
  0x12   : > { %1040 = vmatmul.mubr.msk.f32.vlgmr.msra.gmra.mxu0 %vm255_vm1, %v242_v4  ;;  %1045 = vmatmul.mubr.msk.f32.vlgmr.msra.gmra.mxu1 %vm255_vm1, %v243_v8  ;;  %v253_v5 = vld [vmem:[%s232_s28 + $0x18] sm:$0xff] }
  0x13   : > { %1048 = vmatpush3.xpose.msk.msra.mxu0 %vm255_vm1, %v248_v7  ;;  %1049 = vmatprep.mubr.msk.f32.mxu0 %vm1113_vm0, %v1112_v0  ;;  %vm566_vm3 = vcmp.eq.s32.totalorder %v565_v19, 1 }
  0x14   : > { %1053 = vmatpush3.xpose.msk.msra.mxu1 %vm255_vm1, %v249_v10  ;;  %1054 = vmatprep.mubr.msk.f32.mxu1 %vm1113_vm0, %v1112_v0 }
  0x15   : > { %1057 = vmatprep.subr.mxu0 %v1112_v0  ;;  %1062 = vmatprep.subr.mxu1 %v1112_v0 }
  0x16   : > { %1050 = vmatmul.mubr.msk.f32.vlgmr.msra.gmra.mxu0 %vm255_vm1, %v244_v11 }
  0x17   : > { %1055 = vmatmul.mubr.msk.f32.vlgmr.msra.gmra.mxu1 %vm255_vm1, %v245_v12  ;;  %1059 = vmatprep.mubr.msk.f32.mxu0 %vm1113_vm0, %v1112_v0 }
  0x18   : > { %1064 = vmatprep.mubr.msk.f32.mxu1 %vm1113_vm0, %v1112_v0  ;;  %1058 = vmatpush3.msra.mxu0 %v250_v56 }
  0x19   : > { %1067 = vmatprep.subr.mxu0 %v1112_v0  ;;  %1063 = vmatpush3.msra.mxu1 %v251_v57 }
  0x1a   : > { %1072 = vmatprep.subr.mxu1 %v1112_v0 }
  0xd2   : > { %v328_v20 = vpop.f32.mrf.mxu0  ;;  %v404_v21 = vpop.f32.mrf.mxu1 }
  0xd3   : > { %v567_v22 = vsel %vm566_vm3, -1e+09, %v328_v20  ;;  %v568_v23 = vsel %vm566_vm3, -1e+09, %v404_v21 }
  0xd4   : > { %v1041_v24 = vpop.f32.mrf.mxu0  ;;  %v571_v25 = vsel %vm255_vm1, %v567_v22, -inf  ;;  %v1046_v26 = vpop.f32.mrf.mxu1  ;;  %v574_v28 = vsel %vm255_vm1, %v568_v23, -inf }
  0xd5   : > { %572 = vmax.xlane.f32.xlu0 %v571_v25 }
  0xd6   : > { %v480_v27 = vpop.f32.mrf.mxu0 }
  0xd7   : > { %v569_v29 = vsel %vm566_vm3, -1e+09, %v480_v27  ;;  %v556_v30 = vpop.f32.mrf.mxu1 }
  0xd8   : > { %v1051_v31 = vpop.f32.mrf.mxu0  ;;  %v570_v32 = vsel %vm566_vm3, -1e+09, %v556_v30  ;;  %v577_v33 = vsel %vm255_vm1, %v569_v29, -inf }
  0xd9   : > { %575 = vmax.xlane.f32.xlu0 %v574_v28  ;;  %578 = vmax.xlane.f32.xlu1 %v577_v33  ;;  %v1056_v34 = vpop.f32.mrf.mxu1  ;;  %v580_v35 = vsel %vm255_vm1, %v570_v32, -inf }
  0xdd   : > { %581 = vmax.xlane.f32.xlu1 %v580_v35 }
 0x15e   : > { %v573_v36 = vpop.xlane.xlu0 %572 }
 0x15f   : > { %v583_v37 = vsub.f32 %v567_v22, %v573_v36 }
 0x161   : > { %v587_v38 = vmul.f32 1.442695, %v583_v37 }
 0x162   : > { %v576_v39 = vpop.xlane.xlu0 %575  ;;  %v579_v40 = vpop.xlane.xlu1 %578 }
 0x163   : > { %1088 = vpow2.f32 %v587_v38  ;;  %v584_v41 = vsub.f32 %v568_v23, %v576_v39  ;;  %v585_v42 = vsub.f32 %v569_v29, %v579_v40 }
 0x165   : > { %v589_v43 = vmul.f32 1.442695, %v584_v41  ;;  %v591_v44 = vmul.f32 1.442695, %v585_v42 }
 0x166   : > { %v582_v45 = vpop.xlane.xlu1 %581 }
 0x167   : > { %1090 = vpow2.f32 %v589_v43  ;;  %v586_v46 = vsub.f32 %v570_v32, %v582_v45 }
 0x168   : > { %1092 = vpow2.f32 %v591_v44 }
 0x169   : > { %v593_v47 = vmul.f32 1.442695, %v586_v46 }
 0x16b   : > { %1094 = vpow2.f32 %v593_v47 }
 0x170   : > { %v1089_v48 = vpop.eup %1088 }
 0x171   : > { %v595_v49 = vsel %vm255_vm1, %v1089_v48, 0.0 }
 0x172   : > { %596 = vadd.xlane.f32.xlu0 %v595_v49 }
 0x174   : > { %v1091_v50 = vpop.eup %1090 }
 0x175   : > { %v1093_v51 = vpop.eup %1092  ;;  %v598_v52 = vsel %vm255_vm1, %v1091_v50, 0.0 }
 0x176   : > { %599 = vadd.xlane.f32.xlu1 %v598_v52  ;;  %v601_v53 = vsel %vm255_vm1, %v1093_v51, 0.0 }
 0x177   : > { %602 = vadd.xlane.f32.xlu0 %v601_v53 }
 0x178   : > { %v1095_v54 = vpop.eup %1094 }
 0x179   : > { %v604_v55 = vsel %vm255_vm1, %v1095_v54, 0.0 }
 0x17a   : > { %605 = vadd.xlane.f32.xlu1 %v604_v55 }
 0x1fb   : > { %v597_v58 = vpop.xlane.xlu0 %596 }
 0x1fc   : > { %1096 = vrcp.f32 %v597_v58 }
 0x1ff   : > { %v600_v59 = vpop.xlane.xlu1 %599 }
 0x200   : > { %v603_v60 = vpop.xlane.xlu0 %602  ;;  %1098 = vrcp.f32 %v600_v59 }
 0x201   : > { %1100 = vrcp.f32 %v603_v60 }
 0x203   : > { %v606_v61 = vpop.xlane.xlu1 %605 }
 0x204   : > { %1102 = vrcp.f32 %v606_v61 }
 0x209   : > { %v1097_v62 = vpop.eup %1096 }
 0x20a   : > { %v611_v63 = vmul.f32 %v1097_v62, %v1089_v48 }
 0x20c   : > { %1060 = vmatmul.mubr.msk.f32.vlgmr.msra.gmra.mxu0 %vm255_vm1, %v611_v63 }
 0x20d   : > { %v1099_v2 = vpop.eup %1098  ;;  %1068 = vmatpush3.msra.mxu0 %v252_v1  ;;  %1069 = vmatprep.mubr.msk.f32.mxu0 %vm1113_vm0, %v1112_v0 }
 0x20e   : > { %v1101_v3 = vpop.eup %1100  ;;  %v612_v4 = vmul.f32 %v1099_v2, %v1091_v50 }
 0x20f   : > { %v613_v6 = vmul.f32 %v1101_v3, %v1093_v51 }
 0x210   : > { %1065 = vmatmul.mubr.msk.f32.vlgmr.msra.gmra.mxu1 %vm255_vm1, %v612_v4 }
 0x211   : > { %v1103_v7 = vpop.eup %1102  ;;  %1070 = vmatmul.mubr.msk.f32.vlgmr.msra.gmra.mxu0 %vm255_vm1, %v613_v6  ;;  %1073 = vmatpush3.msra.mxu1 %v253_v5 }
 0x212   : > { %1074 = vmatprep.mubr.msk.f32.mxu1 %vm1113_vm0, %v1112_v0  ;;  %v614_v8 = vmul.f32 %v1103_v7, %v1095_v54 }
 0x214   : > { %1075 = vmatmul.mubr.msk.f32.vlgmr.msra.gmra.mxu1 %vm255_vm1, %v614_v8 }
 0x2cc   : > { %v684_v9 = vpop.f32.mrf.mxu0 }
 0x2cd   : > { %907 = vst.msk [vmem:[%s237_s5] sm:$0xff] %vm255_vm1, %v684_v9 }
 0x2ce   : > { %v1061_v10 = vpop.f32.mrf.mxu0 }
 0x2d0   : > { %v757_v11 = vpop.f32.mrf.mxu1 }
 0x2d1   : > { %908 = vst.msk [vmem:[%s237_s5 + $0x8] sm:$0xff] %vm255_vm1, %v757_v11  ;;  %v830_v12 = vpop.f32.mrf.mxu0 }
 0x2d2   : > { %909 = vst.msk [vmem:[%s237_s5 + $0x10] sm:$0xff] %vm255_vm1, %v830_v12  ;;  %v1066_v13 = vpop.f32.mrf.mxu1 }
 0x2d3   : > { %v1071_v14 = vpop.f32.mrf.mxu0 }
 0x2d4   : > { %v903_v0 = vpop.f32.mrf.mxu1 }
 0x2d5   : > { %910 = vst.msk [vmem:[%s237_s5 + $0x18] sm:$0xff] %vm255_vm1, %v903_v0 }
 0x2d6   : > { %v1076_v15 = vpop.f32.mrf.mxu1 }
 0x2d7 PF: > { %s14_s15 = sadd.s32 1, %s1110_s15  }
 0x2d8   : > { %p11_p4 = scmp.ge.s32.totalorder %s14_s15, 4  }
 0x2da   :  { %13 = sbr.rel (!%p11_p4) target bundleno = 1 (0x1), region = 72 }

</bundles_post_ra>
